<compile_context>
chip_gen: v7x
topology: tpu7x:2x2x1
jax: 0.10.0
libtpu: 0.0.40
codegen_flags: <defaults>
</compile_context>

<pallas_src>
import functools

import jax
import jax.numpy as jnp
from jax.experimental import pallas as pl
from jax.experimental.pallas import tpu as pltpu


def _conv_mean_kernel(x_ref, b_ref, o_ref, *, KH, Cin, Ho, inv_count):
    # x_ref: (N, Cin, H, W)   raw NCHW input, W=128 is the lane axis
    # b_ref: (KH*Cin, W, Cout) "smeared" weights (kw-window sums pre-applied)
    # o_ref: (N, Cout)
    N = x_ref.shape[0]
    Cout = o_ref.shape[-1]
    for n in range(N):                      # static unroll (N == 1 for this module)
        acc = jnp.zeros((1, Cout), jnp.float32)
        for kh in range(KH):
            # Sum the Ho valid output rows for this kernel-row offset:
            # (Cin, Ho, W) -> (Cin, W).  Cheap sublane (XLU) reduce.
            rowsum = jnp.sum(x_ref[n, :, kh:kh + Ho, :], axis=1)
            for cin in range(Cin):
                r = kh * Cin + cin
                acc = acc + jnp.dot(
                    rowsum[cin:cin + 1, :], b_ref[r],
                    preferred_element_type=jnp.float32)
        o_ref[pl.ds(n, 1), :] = (acc * inv_count).astype(o_ref.dtype)


def combo_conv2d_meandim(x_nchw, weight_oihw):
    """Conv2d(3->10, k=5, s=1, no bias, VALID) + AdaptiveAvgPool2d((1,1))."""
    N, Cin, H, W = x_nchw.shape
    Cout, Cin_w, KH, KW = weight_oihw.shape
    assert Cin == Cin_w
    Ho, Wo = H - KH + 1, W - KW + 1

    # ---- weight prep (tiny, pure glue): fold the kw-window sum into the weight.
    # B[kh*Cin+cin, w, cout] = sum_{kw : kw <= w < kw + Wo} weight[cout, cin, kh, kw]
    wt = jnp.transpose(weight_oihw, (2, 1, 3, 0))                 # (KH, Cin, KW, Cout)
    w_pos = jnp.arange(W)[:, None]                                # (W, 1)
    k_pos = jnp.arange(KW)[None, :]                               # (1, KW)
    band = ((w_pos >= k_pos) & (w_pos < k_pos + Wo)).astype(x_nchw.dtype)  # (W, KW)
    b = jnp.einsum("wk,hcko->hcwo", band, wt).reshape(KH * Cin, W, Cout)

    kernel = functools.partial(
        _conv_mean_kernel, KH=KH, Cin=Cin, Ho=Ho,
        inv_count=1.0 / float(Ho * Wo))

    out = pl.pallas_call(
        kernel,
        out_shape=jax.ShapeDtypeStruct((N, Cout), x_nchw.dtype),
        grid_spec=pltpu.PrefetchScalarGridSpec(
            num_scalar_prefetch=0,
            grid=(1,),  # single step: the whole 196 KB input fits easily in VMEM
            in_specs=[
                pl.BlockSpec((N, Cin, H, W), lambda i: (0, 0, 0, 0)),
                pl.BlockSpec((KH * Cin, W, Cout), lambda i: (0, 0, 0)),
            ],
            out_specs=pl.BlockSpec((N, Cout), lambda i: (0, 0)),
        ),
        compiler_params=pltpu.CompilerParams(
            dimension_semantics=("arbitrary",),
        ),
    )(x_nchw, b)

    return out.reshape(N, Cout, 1, 1)


if __name__ == "__main__":
    key = jax.random.PRNGKey(0)
    kx, kw_key = jax.random.split(key)

    # matches ComboConv2dMeandim.get_inputs(): (1, 3, 128, 128)
    x = jax.random.normal(kx, (1, 3, 128, 128), dtype=jnp.float32)

    # Conv2d(3, 10, kernel_size=5, bias=False) weight: (Cout, Cin, KH, KW)
    fan_in = 3 * 5 * 5
    weight = jax.random.normal(kw_key, (10, 3, 5, 5), dtype=jnp.float32) * (1.0 / fan_in) ** 0.5

    fn = jax.jit(combo_conv2d_meandim)
    out = jax.block_until_ready(fn(x, weight))

    # reference: conv (VALID, stride 1) then mean over H, W keeping dims -> (1, 10, 1, 1)
    ref_conv = jax.lax.conv_general_dilated(
        x, weight, window_strides=(1, 1), padding="VALID",
        dimension_numbers=("NCHW", "OIHW", "NCHW"))
    ref = jnp.mean(ref_conv, axis=(2, 3), keepdims=True)

    assert out.shape == (1, 10, 1, 1), out.shape
    assert jnp.allclose(out, ref, rtol=1e-3, atol=1e-3), "mismatch vs reference"
    print("KERNEL_OK")
</pallas_src>

<mosaic_0001>
module attributes {stable_mosaic.version = 11 : i64} {
  func.func @_conv_mean_kernel(%arg0: i32, %arg1: memref<1x3x128x128xf32, #tpu.memory_space<vmem>>, %arg2: memref<15x128x10xf32, #tpu.memory_space<vmem>>, %arg3: memref<1x10xf32, #tpu.memory_space<vmem>>) attributes {dimension_semantics = [#tpu.dimension_semantics<arbitrary>], iteration_bounds = array<i64: 1>, scalar_prefetch = 0 : i64, scratch_operands = 0 : i64, tpu.core_type = #tpu.core_type<tc>, window_params = [{pipeline_mode = #tpu.pipeline_mode<synchronous>, transform_indices = @transform_0, window_bounds = array<i64: 1, 3, 128, 128>}, {pipeline_mode = #tpu.pipeline_mode<synchronous>, transform_indices = @transform_1, window_bounds = array<i64: 15, 128, 10>}, {pipeline_mode = #tpu.pipeline_mode<synchronous>, transform_indices = @transform_2, window_bounds = array<i64: 1, 10>}]} {
    %cst = arith.constant 0.000000e+00 : f32
    %0 = vector.broadcast %cst : f32 to vector<1x10xf32>
    %c0 = arith.constant 0 : index
    %c0_0 = arith.constant 0 : index
    %c0_1 = arith.constant 0 : index
    %c0_2 = arith.constant 0 : index
    %1 = vector.load %arg1[%c0, %c0_0, %c0_1, %c0_2] : memref<1x3x128x128xf32, #tpu.memory_space<vmem>>, vector<1x3x124x128xf32>
    %2 = vector.shape_cast %1 : vector<1x3x124x128xf32> to vector<3x124x128xf32>
    %cst_3 = arith.constant dense<0.000000e+00> : vector<3x128xf32>
    %3 = vector.multi_reduction <add>, %2, %cst_3 [1] : vector<3x124x128xf32> to vector<3x128xf32>
    %4 = vector.extract_strided_slice %3 {offsets = [0, 0], sizes = [1, 128], strides = [1, 1]} : vector<3x128xf32> to vector<1x128xf32>
    %c0_4 = arith.constant 0 : index
    %c0_5 = arith.constant 0 : index
    %c0_6 = arith.constant 0 : index
    %5 = vector.load %arg2[%c0_4, %c0_5, %c0_6] : memref<15x128x10xf32, #tpu.memory_space<vmem>>, vector<1x128x10xf32>
    %6 = vector.shape_cast %5 : vector<1x128x10xf32> to vector<128x10xf32>
    %cst_7 = arith.constant dense<0.000000e+00> : vector<1x10xf32>
    %7 = tpu.matmul %4, %6, %cst_7 {dimension_numbers = #tpu.dot_dimension_numbers<[1], [0], [0], [1], [0, 0, 1, 1], [], []>} : vector<1x128xf32>, vector<128x10xf32>, vector<1x10xf32> -> vector<1x10xf32>
    %8 = arith.addf %0, %7 : vector<1x10xf32>
    %9 = vector.extract_strided_slice %3 {offsets = [1, 0], sizes = [1, 128], strides = [1, 1]} : vector<3x128xf32> to vector<1x128xf32>
    %c1 = arith.constant 1 : index
    %c0_8 = arith.constant 0 : index
    %c0_9 = arith.constant 0 : index
    %10 = vector.load %arg2[%c1, %c0_8, %c0_9] : memref<15x128x10xf32, #tpu.memory_space<vmem>>, vector<1x128x10xf32>
    %11 = vector.shape_cast %10 : vector<1x128x10xf32> to vector<128x10xf32>
    %cst_10 = arith.constant dense<0.000000e+00> : vector<1x10xf32>
    %12 = tpu.matmul %9, %11, %cst_10 {dimension_numbers = #tpu.dot_dimension_numbers<[1], [0], [0], [1], [0, 0, 1, 1], [], []>} : vector<1x128xf32>, vector<128x10xf32>, vector<1x10xf32> -> vector<1x10xf32>
    %13 = arith.addf %8, %12 : vector<1x10xf32>
    %14 = vector.extract_strided_slice %3 {offsets = [2, 0], sizes = [1, 128], strides = [1, 1]} : vector<3x128xf32> to vector<1x128xf32>
    %c2 = arith.constant 2 : index
    %c0_11 = arith.constant 0 : index
    %c0_12 = arith.constant 0 : index
    %15 = vector.load %arg2[%c2, %c0_11, %c0_12] : memref<15x128x10xf32, #tpu.memory_space<vmem>>, vector<1x128x10xf32>
    %16 = vector.shape_cast %15 : vector<1x128x10xf32> to vector<128x10xf32>
    %cst_13 = arith.constant dense<0.000000e+00> : vector<1x10xf32>
    %17 = tpu.matmul %14, %16, %cst_13 {dimension_numbers = #tpu.dot_dimension_numbers<[1], [0], [0], [1], [0, 0, 1, 1], [], []>} : vector<1x128xf32>, vector<128x10xf32>, vector<1x10xf32> -> vector<1x10xf32>
    %18 = arith.addf %13, %17 : vector<1x10xf32>
    %c0_14 = arith.constant 0 : index
    %c0_15 = arith.constant 0 : index
    %c1_16 = arith.constant 1 : index
    %c0_17 = arith.constant 0 : index
    %19 = vector.load %arg1[%c0_14, %c0_15, %c1_16, %c0_17] : memref<1x3x128x128xf32, #tpu.memory_space<vmem>>, vector<1x3x124x128xf32>
    %20 = vector.shape_cast %19 : vector<1x3x124x128xf32> to vector<3x124x128xf32>
    %cst_18 = arith.constant dense<0.000000e+00> : vector<3x128xf32>
    %21 = vector.multi_reduction <add>, %20, %cst_18 [1] : vector<3x124x128xf32> to vector<3x128xf32>
    %22 = vector.extract_strided_slice %21 {offsets = [0, 0], sizes = [1, 128], strides = [1, 1]} : vector<3x128xf32> to vector<1x128xf32>
    %c3 = arith.constant 3 : index
    %c0_19 = arith.constant 0 : index
    %c0_20 = arith.constant 0 : index
    %23 = vector.load %arg2[%c3, %c0_19, %c0_20] : memref<15x128x10xf32, #tpu.memory_space<vmem>>, vector<1x128x10xf32>
    %24 = vector.shape_cast %23 : vector<1x128x10xf32> to vector<128x10xf32>
    %cst_21 = arith.constant dense<0.000000e+00> : vector<1x10xf32>
    %25 = tpu.matmul %22, %24, %cst_21 {dimension_numbers = #tpu.dot_dimension_numbers<[1], [0], [0], [1], [0, 0, 1, 1], [], []>} : vector<1x128xf32>, vector<128x10xf32>, vector<1x10xf32> -> vector<1x10xf32>
    %26 = arith.addf %18, %25 : vector<1x10xf32>
    %27 = vector.extract_strided_slice %21 {offsets = [1, 0], sizes = [1, 128], strides = [1, 1]} : vector<3x128xf32> to vector<1x128xf32>
    %c4 = arith.constant 4 : index
    %c0_22 = arith.constant 0 : index
    %c0_23 = arith.constant 0 : index
    %28 = vector.load %arg2[%c4, %c0_22, %c0_23] : memref<15x128x10xf32, #tpu.memory_space<vmem>>, vector<1x128x10xf32>
    %29 = vector.shape_cast %28 : vector<1x128x10xf32> to vector<128x10xf32>
    %cst_24 = arith.constant dense<0.000000e+00> : vector<1x10xf32>
    %30 = tpu.matmul %27, %29, %cst_24 {dimension_numbers = #tpu.dot_dimension_numbers<[1], [0], [0], [1], [0, 0, 1, 1], [], []>} : vector<1x128xf32>, vector<128x10xf32>, vector<1x10xf32> -> vector<1x10xf32>
    %31 = arith.addf %26, %30 : vector<1x10xf32>
    %32 = vector.extract_strided_slice %21 {offsets = [2, 0], sizes = [1, 128], strides = [1, 1]} : vector<3x128xf32> to vector<1x128xf32>
    %c5 = arith.constant 5 : index
    %c0_25 = arith.constant 0 : index
    %c0_26 = arith.constant 0 : index
    %33 = vector.load %arg2[%c5, %c0_25, %c0_26] : memref<15x128x10xf32, #tpu.memory_space<vmem>>, vector<1x128x10xf32>
    %34 = vector.shape_cast %33 : vector<1x128x10xf32> to vector<128x10xf32>
    %cst_27 = arith.constant dense<0.000000e+00> : vector<1x10xf32>
    %35 = tpu.matmul %32, %34, %cst_27 {dimension_numbers = #tpu.dot_dimension_numbers<[1], [0], [0], [1], [0, 0, 1, 1], [], []>} : vector<1x128xf32>, vector<128x10xf32>, vector<1x10xf32> -> vector<1x10xf32>
    %36 = arith.addf %31, %35 : vector<1x10xf32>
    %c0_28 = arith.constant 0 : index
    %c0_29 = arith.constant 0 : index
    %c2_30 = arith.constant 2 : index
    %c0_31 = arith.constant 0 : index
    %37 = vector.load %arg1[%c0_28, %c0_29, %c2_30, %c0_31] : memref<1x3x128x128xf32, #tpu.memory_space<vmem>>, vector<1x3x124x128xf32>
    %38 = vector.shape_cast %37 : vector<1x3x124x128xf32> to vector<3x124x128xf32>
    %cst_32 = arith.constant dense<0.000000e+00> : vector<3x128xf32>
    %39 = vector.multi_reduction <add>, %38, %cst_32 [1] : vector<3x124x128xf32> to vector<3x128xf32>
    %40 = vector.extract_strided_slice %39 {offsets = [0, 0], sizes = [1, 128], strides = [1, 1]} : vector<3x128xf32> to vector<1x128xf32>
    %c6 = arith.constant 6 : index
    %c0_33 = arith.constant 0 : index
    %c0_34 = arith.constant 0 : index
    %41 = vector.load %arg2[%c6, %c0_33, %c0_34] : memref<15x128x10xf32, #tpu.memory_space<vmem>>, vector<1x128x10xf32>
    %42 = vector.shape_cast %41 : vector<1x128x10xf32> to vector<128x10xf32>
    %cst_35 = arith.constant dense<0.000000e+00> : vector<1x10xf32>
    %43 = tpu.matmul %40, %42, %cst_35 {dimension_numbers = #tpu.dot_dimension_numbers<[1], [0], [0], [1], [0, 0, 1, 1], [], []>} : vector<1x128xf32>, vector<128x10xf32>, vector<1x10xf32> -> vector<1x10xf32>
    %44 = arith.addf %36, %43 : vector<1x10xf32>
    %45 = vector.extract_strided_slice %39 {offsets = [1, 0], sizes = [1, 128], strides = [1, 1]} : vector<3x128xf32> to vector<1x128xf32>
    %c7 = arith.constant 7 : index
    %c0_36 = arith.constant 0 : index
    %c0_37 = arith.constant 0 : index
    %46 = vector.load %arg2[%c7, %c0_36, %c0_37] : memref<15x128x10xf32, #tpu.memory_space<vmem>>, vector<1x128x10xf32>
    %47 = vector.shape_cast %46 : vector<1x128x10xf32> to vector<128x10xf32>
    %cst_38 = arith.constant dense<0.000000e+00> : vector<1x10xf32>
    %48 = tpu.matmul %45, %47, %cst_38 {dimension_numbers = #tpu.dot_dimension_numbers<[1], [0], [0], [1], [0, 0, 1, 1], [], []>} : vector<1x128xf32>, vector<128x10xf32>, vector<1x10xf32> -> vector<1x10xf32>
    %49 = arith.addf %44, %48 : vector<1x10xf32>
    %50 = vector.extract_strided_slice %39 {offsets = [2, 0], sizes = [1, 128], strides = [1, 1]} : vector<3x128xf32> to vector<1x128xf32>
    %c8 = arith.constant 8 : index
    %c0_39 = arith.constant 0 : index
    %c0_40 = arith.constant 0 : index
    %51 = vector.load %arg2[%c8, %c0_39, %c0_40] : memref<15x128x10xf32, #tpu.memory_space<vmem>>, vector<1x128x10xf32>
    %52 = vector.shape_cast %51 : vector<1x128x10xf32> to vector<128x10xf32>
    %cst_41 = arith.constant dense<0.000000e+00> : vector<1x10xf32>
    %53 = tpu.matmul %50, %52, %cst_41 {dimension_numbers = #tpu.dot_dimension_numbers<[1], [0], [0], [1], [0, 0, 1, 1], [], []>} : vector<1x128xf32>, vector<128x10xf32>, vector<1x10xf32> -> vector<1x10xf32>
    %54 = arith.addf %49, %53 : vector<1x10xf32>
    %c0_42 = arith.constant 0 : index
    %c0_43 = arith.constant 0 : index
    %c3_44 = arith.constant 3 : index
    %c0_45 = arith.constant 0 : index
    %55 = vector.load %arg1[%c0_42, %c0_43, %c3_44, %c0_45] : memref<1x3x128x128xf32, #tpu.memory_space<vmem>>, vector<1x3x124x128xf32>
    %56 = vector.shape_cast %55 : vector<1x3x124x128xf32> to vector<3x124x128xf32>
    %cst_46 = arith.constant dense<0.000000e+00> : vector<3x128xf32>
    %57 = vector.multi_reduction <add>, %56, %cst_46 [1] : vector<3x124x128xf32> to vector<3x128xf32>
    %58 = vector.extract_strided_slice %57 {offsets = [0, 0], sizes = [1, 128], strides = [1, 1]} : vector<3x128xf32> to vector<1x128xf32>
    %c9 = arith.constant 9 : index
    %c0_47 = arith.constant 0 : index
    %c0_48 = arith.constant 0 : index
    %59 = vector.load %arg2[%c9, %c0_47, %c0_48] : memref<15x128x10xf32, #tpu.memory_space<vmem>>, vector<1x128x10xf32>
    %60 = vector.shape_cast %59 : vector<1x128x10xf32> to vector<128x10xf32>
    %cst_49 = arith.constant dense<0.000000e+00> : vector<1x10xf32>
    %61 = tpu.matmul %58, %60, %cst_49 {dimension_numbers = #tpu.dot_dimension_numbers<[1], [0], [0], [1], [0, 0, 1, 1], [], []>} : vector<1x128xf32>, vector<128x10xf32>, vector<1x10xf32> -> vector<1x10xf32>
    %62 = arith.addf %54, %61 : vector<1x10xf32>
    %63 = vector.extract_strided_slice %57 {offsets = [1, 0], sizes = [1, 128], strides = [1, 1]} : vector<3x128xf32> to vector<1x128xf32>
    %c10 = arith.constant 10 : index
    %c0_50 = arith.constant 0 : index
    %c0_51 = arith.constant 0 : index
    %64 = vector.load %arg2[%c10, %c0_50, %c0_51] : memref<15x128x10xf32, #tpu.memory_space<vmem>>, vector<1x128x10xf32>
    %65 = vector.shape_cast %64 : vector<1x128x10xf32> to vector<128x10xf32>
    %cst_52 = arith.constant dense<0.000000e+00> : vector<1x10xf32>
    %66 = tpu.matmul %63, %65, %cst_52 {dimension_numbers = #tpu.dot_dimension_numbers<[1], [0], [0], [1], [0, 0, 1, 1], [], []>} : vector<1x128xf32>, vector<128x10xf32>, vector<1x10xf32> -> vector<1x10xf32>
    %67 = arith.addf %62, %66 : vector<1x10xf32>
    %68 = vector.extract_strided_slice %57 {offsets = [2, 0], sizes = [1, 128], strides = [1, 1]} : vector<3x128xf32> to vector<1x128xf32>
    %c11 = arith.constant 11 : index
    %c0_53 = arith.constant 0 : index
    %c0_54 = arith.constant 0 : index
    %69 = vector.load %arg2[%c11, %c0_53, %c0_54] : memref<15x128x10xf32, #tpu.memory_space<vmem>>, vector<1x128x10xf32>
    %70 = vector.shape_cast %69 : vector<1x128x10xf32> to vector<128x10xf32>
    %cst_55 = arith.constant dense<0.000000e+00> : vector<1x10xf32>
    %71 = tpu.matmul %68, %70, %cst_55 {dimension_numbers = #tpu.dot_dimension_numbers<[1], [0], [0], [1], [0, 0, 1, 1], [], []>} : vector<1x128xf32>, vector<128x10xf32>, vector<1x10xf32> -> vector<1x10xf32>
    %72 = arith.addf %67, %71 : vector<1x10xf32>
    %c0_56 = arith.constant 0 : index
    %c0_57 = arith.constant 0 : index
    %c4_58 = arith.constant 4 : index
    %c0_59 = arith.constant 0 : index
    %73 = vector.load %arg1[%c0_56, %c0_57, %c4_58, %c0_59] : memref<1x3x128x128xf32, #tpu.memory_space<vmem>>, vector<1x3x124x128xf32>
    %74 = vector.shape_cast %73 : vector<1x3x124x128xf32> to vector<3x124x128xf32>
    %cst_60 = arith.constant dense<0.000000e+00> : vector<3x128xf32>
    %75 = vector.multi_reduction <add>, %74, %cst_60 [1] : vector<3x124x128xf32> to vector<3x128xf32>
    %76 = vector.extract_strided_slice %75 {offsets = [0, 0], sizes = [1, 128], strides = [1, 1]} : vector<3x128xf32> to vector<1x128xf32>
    %c12 = arith.constant 12 : index
    %c0_61 = arith.constant 0 : index
    %c0_62 = arith.constant 0 : index
    %77 = vector.load %arg2[%c12, %c0_61, %c0_62] : memref<15x128x10xf32, #tpu.memory_space<vmem>>, vector<1x128x10xf32>
    %78 = vector.shape_cast %77 : vector<1x128x10xf32> to vector<128x10xf32>
    %cst_63 = arith.constant dense<0.000000e+00> : vector<1x10xf32>
    %79 = tpu.matmul %76, %78, %cst_63 {dimension_numbers = #tpu.dot_dimension_numbers<[1], [0], [0], [1], [0, 0, 1, 1], [], []>} : vector<1x128xf32>, vector<128x10xf32>, vector<1x10xf32> -> vector<1x10xf32>
    %80 = arith.addf %72, %79 : vector<1x10xf32>
    %81 = vector.extract_strided_slice %75 {offsets = [1, 0], sizes = [1, 128], strides = [1, 1]} : vector<3x128xf32> to vector<1x128xf32>
    %c13 = arith.constant 13 : index
    %c0_64 = arith.constant 0 : index
    %c0_65 = arith.constant 0 : index
    %82 = vector.load %arg2[%c13, %c0_64, %c0_65] : memref<15x128x10xf32, #tpu.memory_space<vmem>>, vector<1x128x10xf32>
    %83 = vector.shape_cast %82 : vector<1x128x10xf32> to vector<128x10xf32>
    %cst_66 = arith.constant dense<0.000000e+00> : vector<1x10xf32>
    %84 = tpu.matmul %81, %83, %cst_66 {dimension_numbers = #tpu.dot_dimension_numbers<[1], [0], [0], [1], [0, 0, 1, 1], [], []>} : vector<1x128xf32>, vector<128x10xf32>, vector<1x10xf32> -> vector<1x10xf32>
    %85 = arith.addf %80, %84 : vector<1x10xf32>
    %86 = vector.extract_strided_slice %75 {offsets = [2, 0], sizes = [1, 128], strides = [1, 1]} : vector<3x128xf32> to vector<1x128xf32>
    %c14 = arith.constant 14 : index
    %c0_67 = arith.constant 0 : index
    %c0_68 = arith.constant 0 : index
    %87 = vector.load %arg2[%c14, %c0_67, %c0_68] : memref<15x128x10xf32, #tpu.memory_space<vmem>>, vector<1x128x10xf32>
    %88 = vector.shape_cast %87 : vector<1x128x10xf32> to vector<128x10xf32>
    %cst_69 = arith.constant dense<0.000000e+00> : vector<1x10xf32>
    %89 = tpu.matmul %86, %88, %cst_69 {dimension_numbers = #tpu.dot_dimension_numbers<[1], [0], [0], [1], [0, 0, 1, 1], [], []>} : vector<1x128xf32>, vector<128x10xf32>, vector<1x10xf32> -> vector<1x10xf32>
    %90 = arith.addf %85, %89 : vector<1x10xf32>
    %cst_70 = arith.constant 6.50364236E-5 : f32
    %91 = vector.broadcast %cst_70 : f32 to vector<1x10xf32>
    %92 = arith.mulf %90, %91 : vector<1x10xf32>
    %c0_71 = arith.constant 0 : index
    %c0_72 = arith.constant 0 : index
    %93 = vector.load %arg3[%c0_71, %c0_72] : memref<1x10xf32, #tpu.memory_space<vmem>>, vector<1x10xf32>
    tpu.vector_store %arg3[%c0_71, %c0_72], %92 {strides = array<i32>} : memref<1x10xf32, #tpu.memory_space<vmem>>, vector<1x10xf32>,
    return
  }
  func.func @transform_0(%arg0: i32) -> (i32, i32, i32, i32) {
    %c0_i32 = arith.constant 0 : i32
    %c0_i32_0 = arith.constant 0 : i32
    %c0_i32_1 = arith.constant 0 : i32
    %c0_i32_2 = arith.constant 0 : i32
    %c0_i32_3 = arith.constant 0 : i32
    return %c0_i32, %c0_i32_0, %c0_i32_1, %c0_i32_2 : i32, i32, i32, i32
  }
  func.func @transform_1(%arg0: i32) -> (i32, i32, i32) {
    %c0_i32 = arith.constant 0 : i32
    %c0_i32_0 = arith.constant 0 : i32
    %c0_i32_1 = arith.constant 0 : i32
    %c0_i32_2 = arith.constant 0 : i32
    return %c0_i32, %c0_i32_0, %c0_i32_1 : i32, i32, i32
  }
  func.func @transform_2(%arg0: i32) -> (i32, i32) {
    %c0_i32 = arith.constant 0 : i32
    %c0_i32_0 = arith.constant 0 : i32
    %c0_i32_1 = arith.constant 0 : i32
    return %c0_i32, %c0_i32_0 : i32, i32
  }
}

</mosaic_0001>

<bundles_post_ra>
// kernel: combo_conv2d_meandim.1
= control target key start
LH: loop header
LB: loop body
LE: loop exit
PB: predicated region body
PF: predicated region fallthrough
CT: control target
= control target key end

     0   :  { %v3336_v3 = vmov 0.0|0.0   ;;  %vm3337_vm0 = vmmov 0   ;;  %v3338_v11 = vmov 0.0   ;;  %vm74_vm1 = vcmask 1043456   ;;  %s4972_s0 = inlined_call_operand.vmem [shape: f32[1,3,128,128], index: 0, kind: input, shape index: {}]   ;;  %s4973_s1 = inlined_call_operand.vmem [shape: f32[15,128,10], index: 1, kind: input, shape index: {}]   ;;  %s4974_s2 = inlined_call_operand.hbm [shape: f32[1,10], index: 2, kind: output, shape index: {}]  }
   0x1   :  { %v1917_v0 = vld [vmem:[%s4973_s1 + $0x80] sm:$0xff]  ;;  %v1918_v1 = vld [vmem:[%s4973_s1 + $0x88] sm:$0xff]  ;;  %2921 = vmatprep.subr.bf16.mxu1 %v3336_v3  ;;  %3089 = vmatprep.subr.bf16.mxu0 %v3336_v3  ;;  %v1919_v6 = vld [vmem:[%s4973_s1 + $0x90] sm:$0xff] }
   0x2   :  { %v2013_v2 = vld [vmem:[%s4973_s1 + $0x380] sm:$0xff]  ;;  %v2922_v4 = vpack.c.bf16 %v1918_v1, %v1917_v0  ;;  %v2014_v5 = vld [vmem:[%s4973_s1 + $0x388] sm:$0xff]  ;;  %v1920_v7 = vld [vmem:[%s4973_s1 + $0x98] sm:$0xff]  ;;  %2428 = vmatprep.mubr.msk.f32.mxu1 %vm3337_vm0, %v3338_v11  ;;  %2673 = vmatprep.mubr.msk.f32.mxu0 %vm3337_vm0, %v3338_v11 }
   0x3   :  { %v3090_v8 = vpack.c.bf16 %v2014_v5, %v2013_v2  ;;  %v2015_v9 = vld [vmem:[%s4973_s1 + $0x390] sm:$0xff]  ;;  %v2016_v10 = vld [vmem:[%s4973_s1 + $0x398] sm:$0xff]  ;;  %v2925_v12 = vpack.c.bf16 %v1920_v7, %v1919_v6  ;;  %v1921_v14 = vld [vmem:[%s4973_s1 + $0xa0] sm:$0xff] }
   0x4   :  { %2923 = vmatpush3.bf16.msra.mxu1 %v2922_v4  ;;  %v3093_v13 = vpack.c.bf16 %v2016_v10, %v2015_v9  ;;  %v1922_v15 = vld [vmem:[%s4973_s1 + $0xa8] sm:$0xff]  ;;  %v2017_v16 = vld [vmem:[%s4973_s1 + $0x3a0] sm:$0xff]  ;;  %v1923_v20 = vld [vmem:[%s4973_s1 + $0xb0] sm:$0xff] }
   0x5   :  { %3091 = vmatpush3.bf16.msra.mxu0 %v3090_v8  ;;  %2924 = vmatprep.subr.bf16.mxu1 %v3336_v3  ;;  %v2018_v17 = vld [vmem:[%s4973_s1 + $0x3a8] sm:$0xff]  ;;  %v2928_v18 = vpack.c.bf16 %v1922_v15, %v1921_v14  ;;  %v1924_v21 = vld [vmem:[%s4973_s1 + $0xb8] sm:$0xff]  ;;  %v2019_v22 = vld [vmem:[%s4973_s1 + $0x3b0] sm:$0xff] }
   0x6   :  { %3092 = vmatprep.subr.bf16.mxu0 %v3336_v3  ;;  %v3096_v19 = vpack.c.bf16 %v2018_v17, %v2017_v16  ;;  %v2020_v23 = vld [vmem:[%s4973_s1 + $0x3b8] sm:$0xff]  ;;  %v28_v24 = vld [vmem:[%s4972_s0 + $0x80] sm:$0xff]  ;;  %v2931_v25 = vpack.c.bf16 %v1924_v21, %v1923_v20  ;;  %v29_v26 = vld [vmem:[%s4972_s0 + $0x88] sm:$0xff] }
   0x7   :  { %v30_v27 = vld [vmem:[%s4972_s0 + $0x90] sm:$0xff]  ;;  %v3099_v28 = vpack.c.bf16 %v2020_v23, %v2019_v22  ;;  %v1925_v29 = vld [vmem:[%s4973_s1 + $0xc0] sm:$0xff]  ;;  %v1926_v30 = vld [vmem:[%s4973_s1 + $0xc8] sm:$0xff]  ;;  %v83_v31 = vadd.f32 %v29_v26, %v28_v24 }
   0x8   :  { %2926 = vmatpush3.bf16.msra.mxu1 %v2925_v12  ;;  %v2021_v32 = vld [vmem:[%s4973_s1 + $0x3c0] sm:$0xff]  ;;  %v2022_v33 = vld [vmem:[%s4973_s1 + $0x3c8] sm:$0xff]  ;;  %v31_v34 = vld [vmem:[%s4972_s0 + $0x98] sm:$0xff]  ;;  %v2934_v36 = vpack.c.bf16 %v1926_v30, %v1925_v29 }
   0x9   :  { %3094 = vmatpush3.bf16.msra.mxu0 %v3093_v13  ;;  %2927 = vmatprep.subr.bf16.mxu1 %v3336_v3  ;;  %v84_v35 = vadd.f32 %v83_v31, %v30_v27  ;;  %v1927_v37 = vld [vmem:[%s4973_s1 + $0xd0] sm:$0xff]  ;;  %v1928_v38 = vld [vmem:[%s4973_s1 + $0xd8] sm:$0xff]  ;;  %v32_v39 = vld [vmem:[%s4972_s0 + $0xa0] sm:$0xff]  ;;  %v3102_v40 = vpack.c.bf16 %v2022_v33, %v2021_v32 }
   0xa   :  { %3095 = vmatprep.subr.bf16.mxu0 %v3336_v3  ;;  %v2023_v41 = vld [vmem:[%s4973_s1 + $0x3d0] sm:$0xff]  ;;  %v2024_v42 = vld [vmem:[%s4973_s1 + $0x3d8] sm:$0xff]  ;;  %v782_v44 = vld [vmem:[%s4972_s0 + $0x82] sm:$0xff]  ;;  %v2937_v50 = vpack.c.bf16 %v1928_v38, %v1927_v37 }
   0xb   :  { %v85_v43 = vadd.f32 %v84_v35, %v31_v34  ;;  %v33_v45 = vld [vmem:[%s4972_s0 + $0xa8] sm:$0xff]  ;;  %v784_v47 = vld [vmem:[%s4972_s0 + $0x92] sm:$0xff]  ;;  %v785_v52 = vld [vmem:[%s4972_s0 + $0x9a] sm:$0xff]  ;;  %v3105_v53 = vpack.c.bf16 %v2024_v42, %v2023_v41 }
   0xc   :  { %2929 = vmatpush3.bf16.msra.mxu1 %v2928_v18  ;;  %v783_v46 = vld [vmem:[%s4972_s0 + $0x8a] sm:$0xff]  ;;  %v1929_v54 = vld [vmem:[%s4973_s1 + $0xe0] sm:$0xff]  ;;  %v35_v60 = vld [vmem:[%s4972_s0 + $0xb8] sm:$0xff] }
   0xd   :  { %3097 = vmatpush3.bf16.msra.mxu0 %v3096_v19  ;;  %2930 = vmatprep.subr.bf16.mxu1 %v3336_v3  ;;  %v86_v48 = vadd.f32 %v85_v43, %v32_v39  ;;  %v836_v49 = vadd.f32 %v783_v46, %v782_v44  ;;  %v34_v51 = vld [vmem:[%s4972_s0 + $0xb0] sm:$0xff]  ;;  %v1930_v55 = vld [vmem:[%s4973_s1 + $0xe8] sm:$0xff]  ;;  %v2025_v56 = vld [vmem:[%s4973_s1 + $0x3e0] sm:$0xff] }
   0xe   :  { %3098 = vmatprep.subr.bf16.mxu0 %v3336_v3  ;;  %v2026_v59 = vld [vmem:[%s4973_s1 + $0x3e8] sm:$0xff]  ;;  %v2940_v0 = vpack.c.bf16 %v1930_v55, %v1929_v54  ;;  %v36_v1 = vld [vmem:[%s4972_s0 + $0xc0] sm:$0xff]  ;;  %v1931_v5 = vld [vmem:[%s4973_s1 + $0xf0] sm:$0xff] }
   0xf   :  { %v87_v57 = vadd.f32 %v86_v48, %v33_v45  ;;  %v837_v58 = vadd.f32 %v836_v49, %v784_v47  ;;  %v786_v61 = vld [vmem:[%s4972_s0 + $0xa2] sm:$0xff]  ;;  %v787_v2 = vld [vmem:[%s4972_s0 + $0xaa] sm:$0xff]  ;;  %v3108_v4 = vpack.c.bf16 %v2026_v59, %v2025_v56  ;;  %v1932_v6 = vld [vmem:[%s4973_s1 + $0xf8] sm:$0xff] }
  0x10   :  { %2932 = vmatpush3.bf16.msra.mxu1 %v2931_v25  ;;  %v2027_v7 = vld [vmem:[%s4973_s1 + $0x3f0] sm:$0xff]  ;;  %v2028_v10 = vld [vmem:[%s4973_s1 + $0x3f8] sm:$0xff]  ;;  %v37_v12 = vld [vmem:[%s4972_s0 + $0xc8] sm:$0xff]  ;;  %v2943_v16 = vpack.c.bf16 %v1932_v6, %v1931_v5 }
  0x11   :  { %3100 = vmatpush3.bf16.msra.mxu0 %v3099_v28  ;;  %2933 = vmatprep.subr.bf16.mxu1 %v3336_v3  ;;  %v88_v62 = vadd.f32 %v87_v57, %v34_v51  ;;  %v838_v63 = vadd.f32 %v837_v58, %v785_v52  ;;  %v788_v13 = vld [vmem:[%s4972_s0 + $0xb2] sm:$0xff]  ;;  %v789_v18 = vld [vmem:[%s4972_s0 + $0xba] sm:$0xff]  ;;  %v3111_v19 = vpack.c.bf16 %v2028_v10, %v2027_v7  ;;  %v790_v23 = vld [vmem:[%s4972_s0 + $0xc2] sm:$0xff] }
  0x12   :  { %3101 = vmatprep.subr.bf16.mxu0 %v3336_v3  ;;  %v38_v17 = vld [vmem:[%s4972_s0 + $0xd0] sm:$0xff]  ;;  %v39_v22 = vld [vmem:[%s4972_s0 + $0xd8] sm:$0xff]  ;;  %v40_v26 = vld [vmem:[%s4972_s0 + $0xe0] sm:$0xff] }
  0x13   :  { %v89_v8 = vadd.f32 %v88_v62, %v35_v60  ;;  %v839_v9 = vadd.f32 %v838_v63, %v786_v61  ;;  %v791_v27 = vld [vmem:[%s4972_s0 + $0xca] sm:$0xff]  ;;  %v12_v30 = vld [vmem:[%s4972_s0] sm:$0xff]  ;;  %v792_v34 = vld [vmem:[%s4972_s0 + $0xd2] sm:$0xff] }
  0x14   :  { %2935 = vmatpush3.bf16.msra.mxu1 %v2934_v36  ;;  %v13_v31 = vld [vmem:[%s4972_s0 + $0x8] sm:$0xff]  ;;  %v14_v32 = vld [vmem:[%s4972_s0 + $0x10] sm:$0xff]  ;;  %v43_v36 = vld [vmem:[%s4972_s0 + $0xf8] sm:$0xf] }
  0x15   :  { %3103 = vmatpush3.bf16.msra.mxu0 %v3102_v40  ;;  %2936 = vmatprep.subr.bf16.mxu1 %v3336_v3  ;;  %v90_v14 = vadd.f32 %v89_v8, %v36_v1  ;;  %v840_v15 = vadd.f32 %v839_v9, %v787_v2  ;;  %v41_v33 = vld [vmem:[%s4972_s0 + $0xe8] sm:$0xff]  ;;  %v60_v35 = vadd.f32 %v13_v31, %v12_v30  ;;  %v15_v39 = vld [vmem:[%s4972_s0 + $0x18] sm:$0xff]  ;;  %v42_v40 = vld [vmem:[%s4972_s0 + $0xf0] sm:$0xff]  ;;  %v97_v46 = vsel %vm74_vm1, %v43_v36, 0.0 }
  0x16   :  { %3104 = vmatprep.subr.bf16.mxu0 %v3336_v3  ;;  %v793_v41 = vld [vmem:[%s4972_s0 + $0xda] sm:$0xff]  ;;  %v794_v47 = vld [vmem:[%s4972_s0 + $0xe2] sm:$0xff]  ;;  %v800_v54 = vld [vmem:[%s4972_s0 + $0x112] sm:$0xff] }
  0x17   :  { %v91_v20 = vadd.f32 %v90_v14, %v37_v12  ;;  %v841_v21 = vadd.f32 %v840_v15, %v788_v13  ;;  %v61_v42 = vadd.f32 %v60_v35, %v14_v32  ;;  %v16_v45 = vld [vmem:[%s4972_s0 + $0x20] sm:$0xff]  ;;  %v17_v48 = vld [vmem:[%s4972_s0 + $0x28] sm:$0xff]  ;;  %v797_v59 = vld [vmem:[%s4972_s0 + $0xfa] sm:$0xf] }
  0x18   :  { %2938 = vmatpush3.bf16.msra.mxu1 %v2937_v50  ;;  %v798_v52 = vld [vmem:[%s4972_s0 + $0x102] sm:$0xff]  ;;  %v795_v55 = vld [vmem:[%s4972_s0 + $0xea] sm:$0xff]  ;;  %v801_v62 = vld [vmem:[%s4972_s0 + $0x11a] sm:$0xff]  ;;  %v850_v7 = vsel %vm74_vm1, %v797_v59, 0.0 }
  0x19   :  { %3106 = vmatpush3.bf16.msra.mxu0 %v3105_v53  ;;  %2939 = vmatprep.subr.bf16.mxu1 %v3336_v3  ;;  %v92_v24 = vadd.f32 %v91_v20, %v38_v17  ;;  %v842_v25 = vadd.f32 %v841_v21, %v789_v18  ;;  %v62_v49 = vadd.f32 %v61_v42, %v15_v39  ;;  %v799_v53 = vld [vmem:[%s4972_s0 + $0x10a] sm:$0xff]  ;;  %v796_v63 = vld [vmem:[%s4972_s0 + $0xf2] sm:$0xff]  ;;  %v802_v6 = vld [vmem:[%s4972_s0 + $0x122] sm:$0xff] }
  0x1a   :  { %3107 = vmatprep.subr.bf16.mxu0 %v3336_v3  ;;  %v858_v57 = vadd.f32 %v799_v53, %v798_v52  ;;  %v18_v61 = vld [vmem:[%s4972_s0 + $0x30] sm:$0xff]  ;;  %v19_v5 = vld [vmem:[%s4972_s0 + $0x38] sm:$0xff]  ;;  %v20_v13 = vld [vmem:[%s4972_s0 + $0x40] sm:$0xff] }
  0x1b   :  { %v93_v28 = vadd.f32 %v92_v24, %v39_v22  ;;  %v843_v29 = vadd.f32 %v842_v25, %v790_v23  ;;  %v63_v56 = vadd.f32 %v62_v49, %v16_v45  ;;  %v803_v14 = vld [vmem:[%s4972_s0 + $0x12a] sm:$0xff]  ;;  %v804_v20 = vld [vmem:[%s4972_s0 + $0x132] sm:$0xff]  ;;  %v127_v21 = vld [vmem:[%s4973_s1] sm:$0xff] }
  0x1c   :  { %2941 = vmatpush3.bf16.msra.mxu1 %v2940_v0  ;;  %v859_v1 = vadd.f32 %v858_v57, %v800_v54  ;;  %v128_v25 = vld [vmem:[%s4973_s1 + $0x8] sm:$0xff]  ;;  %v129_v36 = vld [vmem:[%s4973_s1 + $0x10] sm:$0xff]  ;;  %v130_v42 = vld [vmem:[%s4973_s1 + $0x18] sm:$0xff] }
  0x1d   :  { %3109 = vmatpush3.bf16.msra.mxu0 %v3108_v4  ;;  %2942 = vmatprep.subr.bf16.mxu1 %v3336_v3  ;;  %v94_v37 = vadd.f32 %v93_v28, %v40_v26  ;;  %v844_v38 = vadd.f32 %v843_v29, %v791_v27  ;;  %v64_v0 = vadd.f32 %v63_v56, %v17_v48  ;;  %v22_v27 = vld [vmem:[%s4972_s0 + $0x50] sm:$0xff]  ;;  %v805_v28 = vld [vmem:[%s4972_s0 + $0x13a] sm:$0xff]  ;;  %v2030_v45 = vld [vmem:[%s4973_s1 + $0x408] sm:$0xff] }
  0x1e   :  { %3110 = vmatprep.subr.bf16.mxu0 %v3336_v3  ;;  %v860_v9 = vadd.f32 %v859_v1, %v801_v62  ;;  %v2946_v35 = vpack.c.bf16 %v128_v25, %v127_v21  ;;  %v44_v48 = vld [vmem:[%s4972_s0 + $0x100] sm:$0xff]  ;;  %v45_v49 = vld [vmem:[%s4972_s0 + $0x108] sm:$0xff]  ;;  %v808_v52 = vld [vmem:[%s4972_s0 + $0x152] sm:$0xff] }
  0x1f   :  { %v95_v43 = vadd.f32 %v94_v37, %v41_v33  ;;  %v845_v44 = vadd.f32 %v844_v38, %v792_v34  ;;  %v65_v8 = vadd.f32 %v64_v0, %v18_v61  ;;  %v23_v33 = vld [vmem:[%s4972_s0 + $0x58] sm:$0xff]  ;;  %v806_v34 = vld [vmem:[%s4972_s0 + $0x142] sm:$0xff]  ;;  %v46_v53 = vld [vmem:[%s4972_s0 + $0x110] sm:$0xff]  ;;  %v105_v54 = vadd.f32 %v45_v49, %v44_v48 }
  0x20   :  { %2944 = vmatpush3.bf16.msra.mxu1 %v2943_v16  ;;  %v861_v16 = vadd.f32 %v860_v9, %v802_v6  ;;  %v131_v56 = vld [vmem:[%s4973_s1 + $0x20] sm:$0xff]  ;;  %v27_v57 = vld [vmem:[%s4972_s0 + $0x78] sm:$0xf]  ;;  %v132_v62 = vld [vmem:[%s4973_s1 + $0x28] sm:$0xff] }
  0x21   :  { %3112 = vmatpush3.bf16.msra.mxu0 %v3111_v19  ;;  %2945 = vmatprep.subr.bf16.mxu1 %v3336_v3  ;;  %v96_v50 = vadd.f32 %v95_v43, %v42_v40  ;;  %v846_v51 = vadd.f32 %v845_v44, %v793_v41  ;;  %v66_v15 = vadd.f32 %v65_v8, %v19_v5  ;;  %v21_v19 = vld [vmem:[%s4972_s0 + $0x48] sm:$0xff]  ;;  %v2029_v41 = vld [vmem:[%s4973_s1 + $0x400] sm:$0xff]  ;;  %v2032_v9 = vld [vmem:[%s4973_s1 + $0x418] sm:$0xff] }
  0x22   :  { %3113 = vmatprep.subr.bf16.mxu0 %v3336_v3  ;;  %v862_v23 = vadd.f32 %v861_v16, %v803_v14  ;;  %v24_v43 = vld [vmem:[%s4972_s0 + $0x60] sm:$0xff]  ;;  %v807_v44 = vld [vmem:[%s4972_s0 + $0x14a] sm:$0xff]  ;;  %v106_v1 = vadd.f32 %v105_v54, %v46_v53  ;;  %v134_v21 = vld [vmem:[%s4973_s1 + $0x38] sm:$0xff] }
  0x23   :  { %v98_v58 = vadd.f32 %v97_v46, %v96_v50  ;;  %v847_v60 = vadd.f32 %v846_v51, %v794_v47  ;;  %v67_v22 = vadd.f32 %v66_v15, %v20_v13  ;;  %v25_v51 = vld [vmem:[%s4972_s0 + $0x68] sm:$0xff]  ;;  %v809_v0 = vld [vmem:[%s4972_s0 + $0x15a] sm:$0xff]  ;;  %v2952_v15 = vpack.c.bf16 %v132_v62, %v131_v56 }
  0x24   :  { %v863_v30 = vadd.f32 %v862_v23, %v804_v20  ;;  %v810_v13 = vld [vmem:[%s4972_s0 + $0x162] sm:$0xff]  ;;  %v1145_v20 = vld [vmem:[%s4972_s0 + $0xb] sm:$0xff] }
  0x25   :  { %v99_v2 = vrot.slane %v98_v58, 4  ;;  %v848_v4 = vadd.f32 %v847_v60, %v795_v55  ;;  %v68_v29 = vadd.f32 %v67_v22, %v21_v19  ;;  %v2949_v55 = vpack.c.bf16 %v130_v42, %v129_v36  ;;  %v47_v60 = vld [vmem:[%s4972_s0 + $0x118] sm:$0xff]  ;;  %v1144_v19 = vld [vmem:[%s4972_s0 + $0x3] sm:$0xff] }
  0x26   :  { %v864_v38 = vadd.f32 %v863_v30, %v805_v28  ;;  %v107_v14 = vadd.f32 %v106_v1, %v47_v60  ;;  %v811_v22 = vld [vmem:[%s4972_s0 + $0x16a] sm:$0xff]  ;;  %v1192_v25 = vadd.f32 %v1145_v20, %v1144_v19  ;;  %v813_v28 = vld [vmem:[%s4972_s0 + $0x17a] sm:$0xf]  ;;  %v135_v42 = vld [vmem:[%s4973_s1 + $0x40] sm:$0xff] }
  0x27   :  { %v100_v10 = vadd.f32 %v99_v2, %v98_v58  ;;  %v849_v12 = vadd.f32 %v848_v4, %v796_v63  ;;  %v69_v37 = vadd.f32 %v68_v29, %v22_v27  ;;  %v26_v63 = vld [vmem:[%s4972_s0 + $0x70] sm:$0xff]  ;;  %v3114_v2 = vpack.c.bf16 %v2030_v45, %v2029_v41  ;;  %v1148_v41 = vld [vmem:[%s4972_s0 + $0x23] sm:$0xff] }
  0x28   :  { %v865_v47 = vadd.f32 %v864_v38, %v806_v34  ;;  %v2031_v4 = vld [vmem:[%s4973_s1 + $0x410] sm:$0xff]  ;;  %v52_v49 = vld [vmem:[%s4972_s0 + $0x140] sm:$0xff] }
  0x29   :  { %v101_v17 = vrot.slane %v100_v10, 2  ;;  %v851_v18 = vadd.f32 %v850_v7, %v849_v12  ;;  %v70_v46 = vadd.f32 %v69_v37, %v23_v33  ;;  %v48_v7 = vld [vmem:[%s4972_s0 + $0x120] sm:$0xff]  ;;  %v75_v12 = vsel %vm74_vm1, %v27_v57, 0.0  ;;  %v50_v30 = vld [vmem:[%s4972_s0 + $0x130] sm:$0xff]  ;;  %v2034_v33 = vld [vmem:[%s4973_s1 + $0x428] sm:$0xff] }
  0x2a   :  { %v866_v59 = vadd.f32 %v865_v47, %v807_v44  ;;  %v108_v23 = vadd.f32 %v107_v14, %v48_v7  ;;  %v812_v34 = vld [vmem:[%s4972_s0 + $0x172] sm:$0xff]  ;;  %v872_v44 = vsel %vm74_vm1, %v813_v28, 0.0  ;;  %v139_v14 = vld [vmem:[%s4973_s1 + $0x60] sm:$0xff] }
  0x2b   :  { %v102_v24 = vadd.f32 %v101_v17, %v100_v10  ;;  %v852_v26 = vrot.slane %v851_v18, 4  ;;  %v71_v58 = vadd.f32 %v70_v46, %v24_v43  ;;  %v133_v10 = vld [vmem:[%s4973_s1 + $0x30] sm:$0xff]  ;;  %v136_v43 = vld [vmem:[%s4973_s1 + $0x48] sm:$0xff] }
  0x2c   :  { %v867_v6 = vadd.f32 %v866_v59, %v808_v52  ;;  %v2955_v37 = vpack.c.bf16 %v134_v21, %v133_v10  ;;  %v2036_v52 = vld [vmem:[%s4973_s1 + $0x438] sm:$0xff]  ;;  %v2958_v56 = vpack.c.bf16 %v136_v43, %v135_v42  ;;  %v137_v60 = vld [vmem:[%s4973_s1 + $0x50] sm:$0xff] }
  0x2d   :  { %v103_v31 = vrot.slane %v102_v24, 1  ;;  %v853_v32 = vadd.f32 %v852_v26, %v851_v18  ;;  %v72_v5 = vadd.f32 %v71_v58, %v25_v51  ;;  %v49_v18 = vld [vmem:[%s4972_s0 + $0x128] sm:$0xff]  ;;  %v3117_v26 = vpack.c.bf16 %v2032_v9, %v2031_v4  ;;  %v2035_v51 = vld [vmem:[%s4973_s1 + $0x430] sm:$0xff]  ;;  %v1151_v4 = vld [vmem:[%s4972_s0 + $0x3b] sm:$0xff] }
  0x2e   :  { %v868_v17 = vadd.f32 %v867_v6, %v809_v0  ;;  %v53_v58 = vld [vmem:[%s4972_s0 + $0x148] sm:$0xff]  ;;  %v1150_v59 = vld [vmem:[%s4972_s0 + $0x33] sm:$0xff]  ;;  %v3123_v0 = vpack.c.bf16 %v2036_v52, %v2035_v51 }
  0x2f   :  { %v104_v39 = vadd.f32 %v103_v31, %v102_v24  ;;  %v854_v40 = vrot.slane %v853_v32, 2  ;;  %v73_v16 = vadd.f32 %v72_v5, %v26_v63  ;;  %v1146_v24 = vld [vmem:[%s4972_s0 + $0x13] sm:$0xff]  ;;  %v1147_v31 = vld [vmem:[%s4972_s0 + $0x1b] sm:$0xff]  ;;  %v2038_v6 = vld [vmem:[%s4973_s1 + $0x448] sm:$0xff] }
  0x30   :  { %v869_v29 = vadd.f32 %v868_v17, %v810_v13  ;;  %v1193_v36 = vadd.f32 %v1192_v25, %v1146_v24  ;;  %v2037_v5 = vld [vmem:[%s4973_s1 + $0x440] sm:$0xff]  ;;  %v2039_v20 = vld [vmem:[%s4973_s1 + $0x450] sm:$0xff] }
  0x31   :  { %2429 = vmatmul.mubr.f32.vlgmr.msra.gmra.mrb[0].mxu1 %v104_v39  ;;  %v855_v50 = vadd.f32 %v854_v40, %v853_v32  ;;  %v76_v27 = vadd.f32 %v75_v12, %v73_v16  ;;  %v2033_v32 = vld [vmem:[%s4973_s1 + $0x420] sm:$0xff]  ;;  %v51_v40 = vld [vmem:[%s4972_s0 + $0x138] sm:$0xff]  ;;  %v3126_v19 = vpack.c.bf16 %v2038_v6, %v2037_v5  ;;  %v1153_v21 = vld [vmem:[%s4972_s0 + $0x4b] sm:$0xff] }
  0x32   :  { %2947 = vmatpush3.bf16.msra.mxu1 %v2946_v35  ;;  %2463 = vmatprep.mubr.msk.f32.mxu1 %vm3337_vm0, %v3338_v11  ;;  %v109_v35 = vadd.f32 %v108_v23, %v49_v18  ;;  %v870_v39 = vadd.f32 %v869_v29, %v811_v22  ;;  %v1194_v46 = vadd.f32 %v1193_v36, %v1147_v31  ;;  %v55_v12 = vld [vmem:[%s4972_s0 + $0x158] sm:$0xff]  ;;  %v1152_v13 = vld [vmem:[%s4972_s0 + $0x43] sm:$0xff]  ;;  %v58_v5 = vld [vmem:[%s4972_s0 + $0x170] sm:$0xff] }
  0x33   :  { %v856_v61 = vrot.slane %v855_v50, 1  ;;  %2948 = vmatprep.subr.bf16.mxu1 %v3336_v3  ;;  %v77_v38 = vrot.slane %v76_v27, 4  ;;  %v3120_v47 = vpack.c.bf16 %v2034_v33, %v2033_v32  ;;  %v2040_v22 = vld [vmem:[%s4973_s1 + $0x458] sm:$0xff]  ;;  %v56_v24 = vld [vmem:[%s4972_s0 + $0x160] sm:$0xff]  ;;  %v141_v32 = vld [vmem:[%s4973_s1 + $0x70] sm:$0xff] }
  0x34   :  { %v110_v45 = vadd.f32 %v109_v35, %v50_v30  ;;  %v871_v48 = vadd.f32 %v870_v39, %v812_v34  ;;  %v1154_v29 = vld [vmem:[%s4972_s0 + $0x53] sm:$0xff]  ;;  %v389_v30 = vld [vmem:[%s4972_s0 + $0x9] sm:$0xff] }
  0x35   :  { %v857_v8 = vadd.f32 %v856_v61, %v855_v50  ;;  %v1149_v50 = vld [vmem:[%s4972_s0 + $0x2b] sm:$0xff]  ;;  %v78_v53 = vadd.f32 %v77_v38, %v76_v27  ;;  %v138_v61 = vld [vmem:[%s4973_s1 + $0x58] sm:$0xff]  ;;  %v388_v27 = vld [vmem:[%s4972_s0 + $0x1] sm:$0xff] }
  0x36   :  { %2950 = vmatpush3.bf16.msra.mxu1 %v2949_v55  ;;  %v111_v54 = vadd.f32 %v110_v45, %v51_v40  ;;  %v1195_v55 = vadd.f32 %v1194_v46, %v1148_v41  ;;  %v873_v57 = vadd.f32 %v872_v44, %v871_v48  ;;  %v2961_v10 = vpack.c.bf16 %v138_v61, %v137_v60  ;;  %v390_v31 = vld [vmem:[%s4972_s0 + $0x11] sm:$0xff]  ;;  %v1155_v38 = vld [vmem:[%s4972_s0 + $0x5b] sm:$0xff]  ;;  %v2042_v41 = vld [vmem:[%s4973_s1 + $0x468] sm:$0xff] }
  0x37   :  { %2674 = vmatmul.mubr.f32.vlgmr.msra.gmra.mrb[0].mxu0 %v857_v8  ;;  %2951 = vmatprep.subr.bf16.mxu1 %v3336_v3  ;;  %v79_v7 = vrot.slane %v78_v53, 2  ;;  %v142_v33 = vld [vmem:[%s4973_s1 + $0x78] sm:$0xff]  ;;  %v436_v36 = vadd.f32 %v389_v30, %v388_v27  ;;  %v2041_v40 = vld [vmem:[%s4973_s1 + $0x460] sm:$0xff]  ;;  %v57_v48 = vld [vmem:[%s4972_s0 + $0x168] sm:$0xff] }
  0x38   :  { %3115 = vmatpush3.bf16.msra.mxu0 %v3114_v2  ;;  %2708 = vmatprep.mubr.msk.f32.mxu0 %vm3337_vm0, %v3338_v11  ;;  %v112_v62 = vadd.f32 %v111_v54, %v52_v49  ;;  %v1196_v63 = vadd.f32 %v1195_v55, %v1149_v50  ;;  %v874_v1 = vrot.slane %v873_v57, 4  ;;  %v54_v2 = vld [vmem:[%s4972_s0 + $0x150] sm:$0xff]  ;;  %v391_v39 = vld [vmem:[%s4972_s0 + $0x19] sm:$0xff]  ;;  %v2967_v46 = vpack.c.bf16 %v142_v33, %v141_v32  ;;  %v392_v49 = vld [vmem:[%s4972_s0 + $0x21] sm:$0xff] }
  0x39   :  { %3116 = vmatprep.subr.bf16.mxu0 %v3336_v3  ;;  %v80_v23 = vadd.f32 %v79_v7, %v78_v53  ;;  %v437_v45 = vadd.f32 %v436_v36, %v390_v31  ;;  %v1934_v50 = vld [vmem:[%s4973_s1 + $0x108] sm:$0xff]  ;;  %v2043_v60 = vld [vmem:[%s4973_s1 + $0x470] sm:$0xff]  ;;  %v2044_v61 = vld [vmem:[%s4973_s1 + $0x478] sm:$0xff] }
  0x3a   :  { %2953 = vmatpush3.bf16.msra.mxu1 %v2952_v15  ;;  %v113_v8 = vadd.f32 %v112_v62, %v53_v58  ;;  %v1197_v9 = vadd.f32 %v1196_v63, %v1150_v59  ;;  %v140_v15 = vld [vmem:[%s4973_s1 + $0x68] sm:$0xff]  ;;  %v875_v16 = vadd.f32 %v874_v1, %v873_v57  ;;  %v1162_v59 = vld [vmem:[%s4972_s0 + $0x93] sm:$0xff]  ;;  %v1937_v27 = vld [vmem:[%s4973_s1 + $0x120] sm:$0xff] }
  0x3b   :  { %2954 = vmatprep.subr.bf16.mxu1 %v3336_v3  ;;  %v2964_v28 = vpack.c.bf16 %v140_v15, %v139_v14  ;;  %v81_v42 = vrot.slane %v80_v23, 1  ;;  %v1156_v52 = vld [vmem:[%s4972_s0 + $0x63] sm:$0xff]  ;;  %v438_v54 = vadd.f32 %v437_v45, %v391_v39  ;;  %v1161_v58 = vld [vmem:[%s4972_s0 + $0x8b] sm:$0xff]  ;;  %v3135_v15 = vpack.c.bf16 %v2044_v61, %v2043_v60  ;;  %v1158_v33 = vld [vmem:[%s4972_s0 + $0x73] sm:$0xff] }
  0x3c   :  { %3118 = vmatpush3.bf16.msra.mxu0 %v3117_v26  ;;  %v114_v17 = vadd.f32 %v113_v8, %v54_v2  ;;  %v1198_v18 = vadd.f32 %v1197_v9, %v1151_v4  ;;  %v876_v34 = vrot.slane %v875_v16, 2  ;;  %v1160_v55 = vld [vmem:[%s4972_s0 + $0x83] sm:$0xff]  ;;  %v1935_v4 = vld [vmem:[%s4973_s1 + $0x110] sm:$0xff]  ;;  %v1936_v8 = vld [vmem:[%s4973_s1 + $0x118] sm:$0xff] }
  0x3d   :  { %3119 = vmatprep.subr.bf16.mxu0 %v3336_v3  ;;  %v393_v57 = vld [vmem:[%s4972_s0 + $0x29] sm:$0xff]  ;;  %v82_v62 = vadd.f32 %v81_v42, %v80_v23  ;;  %v1214_v1 = vadd.f32 %v1161_v58, %v1160_v55  ;;  %v394_v6 = vld [vmem:[%s4972_s0 + $0x31] sm:$0xff]  ;;  %v1941_v55 = vld [vmem:[%s4973_s1 + $0x140] sm:$0xff] }
  0x3e   :  { %2956 = vmatpush3.bf16.msra.mxu1 %v2955_v37  ;;  %v115_v25 = vadd.f32 %v114_v17, %v55_v12  ;;  %v1199_v26 = vadd.f32 %v1198_v18, %v1152_v13  ;;  %v3129_v37 = vpack.c.bf16 %v2040_v22, %v2039_v20  ;;  %v877_v51 = vadd.f32 %v876_v34, %v875_v16  ;;  %v59_v9 = vld [vmem:[%s4972_s0 + $0x178] sm:$0xf]  ;;  %v1157_v16 = vld [vmem:[%s4972_s0 + $0x6b] sm:$0xff]  ;;  %v2045_v17 = vld [vmem:[%s4973_s1 + $0x480] sm:$0xff] }
  0x3f   :  { %2957 = vmatprep.subr.bf16.mxu1 %v3336_v3  ;;  %v1163_v13 = vld [vmem:[%s4972_s0 + $0x9b] sm:$0xff]  ;;  %v1215_v14 = vadd.f32 %v1214_v1, %v1162_v59  ;;  %v2046_v18 = vld [vmem:[%s4973_s1 + $0x488] sm:$0xff]  ;;  %v2973_v22 = vpack.c.bf16 %v1936_v8, %v1935_v4  ;;  %v119_v23 = vsel %vm74_vm1, %v59_v9, 0.0  ;;  %v2047_v32 = vld [vmem:[%s4973_s1 + $0x490] sm:$0xff] }
  0x40   :  { %3121 = vmatpush3.bf16.msra.mxu0 %v3120_v47  ;;  %v1200_v35 = vadd.f32 %v1199_v26, %v1153_v21  ;;  %v116_v43 = vadd.f32 %v115_v25, %v56_v24  ;;  %v1933_v47 = vld [vmem:[%s4973_s1 + $0x100] sm:$0xff]  ;;  %v878_v7 = vrot.slane %v877_v51, 1  ;;  %v1165_v30 = vld [vmem:[%s4972_s0 + $0xab] sm:$0xff]  ;;  %v3138_v31 = vpack.c.bf16 %v2046_v18, %v2045_v17  ;;  %v1166_v39 = vld [vmem:[%s4972_s0 + $0xb3] sm:$0xff] }
  0x41   :  { %3122 = vmatprep.subr.bf16.mxu0 %v3336_v3  ;;  %v2970_v2 = vpack.c.bf16 %v1934_v50, %v1933_v47  ;;  %v1164_v21 = vld [vmem:[%s4972_s0 + $0xa3] sm:$0xff]  ;;  %v395_v24 = vld [vmem:[%s4972_s0 + $0x39] sm:$0xff]  ;;  %v1216_v25 = vadd.f32 %v1215_v14, %v1163_v13  ;;  %v406_v8 = vld [vmem:[%s4972_s0 + $0x91] sm:$0xff] }
  0x42   :  { %2959 = vmatpush3.bf16.msra.mxu1 %v2958_v56  ;;  %v1201_v44 = vadd.f32 %v1200_v35, %v1154_v29  ;;  %v3132_v56 = vpack.c.bf16 %v2042_v41, %v2041_v40  ;;  %v117_v63 = vadd.f32 %v116_v43, %v57_v48  ;;  %v879_v26 = vadd.f32 %v878_v7, %v877_v51  ;;  %v2048_v35 = vld [vmem:[%s4973_s1 + $0x498] sm:$0xff]  ;;  %v396_v41 = vld [vmem:[%s4972_s0 + $0x41] sm:$0xff]  ;;  %v1939_v43 = vld [vmem:[%s4973_s1 + $0x130] sm:$0xff] }
  0x43   :  { %2960 = vmatprep.subr.bf16.mxu1 %v3336_v3  ;;  %v1217_v34 = vadd.f32 %v1216_v25, %v1164_v21  ;;  %v1167_v48 = vld [vmem:[%s4972_s0 + $0xbb] sm:$0xff]  ;;  %v2050_v51 = vld [vmem:[%s4973_s1 + $0x4a8] sm:$0xff]  ;;  %v398_v7 = vld [vmem:[%s4972_s0 + $0x51] sm:$0xff] }
  0x44   :  { %3124 = vmatpush3.bf16.msra.mxu0 %v3123_v0  ;;  %v1202_v53 = vadd.f32 %v1201_v44, %v1155_v38  ;;  %v439_v0 = vadd.f32 %v438_v54, %v392_v49  ;;  %v1940_v44 = vld [vmem:[%s4973_s1 + $0x138] sm:$0xff]  ;;  %v2049_v50 = vld [vmem:[%s4973_s1 + $0x4a0] sm:$0xff]  ;;  %v405_v61 = vld [vmem:[%s4972_s0 + $0x89] sm:$0xff] }
  0x45   :  { %3125 = vmatprep.subr.bf16.mxu0 %v3336_v3  ;;  %v1218_v42 = vadd.f32 %v1217_v34, %v1165_v30  ;;  %v2979_v54 = vpack.c.bf16 %v1940_v44, %v1939_v43  ;;  %v404_v60 = vld [vmem:[%s4972_s0 + $0x81] sm:$0xff]  ;;  %v2052_v1 = vld [vmem:[%s4973_s1 + $0x4b8] sm:$0xff]  ;;  %v1943_v9 = vld [vmem:[%s4973_s1 + $0x150] sm:$0xff] }
  0x46   :  { %2962 = vmatpush3.bf16.msra.mxu1 %v2961_v10  ;;  %v1203_v10 = vadd.f32 %v1202_v53, %v1156_v52  ;;  %v440_v12 = vadd.f32 %v439_v0, %v393_v57  ;;  %v1942_v57 = vld [vmem:[%s4973_s1 + $0x148] sm:$0xff]  ;;  %v2051_v0 = vld [vmem:[%s4973_s1 + $0x4b0] sm:$0xff]  ;;  %v407_v25 = vld [vmem:[%s4972_s0 + $0x99] sm:$0xff] }
  0x47   :  { %2963 = vmatprep.subr.bf16.mxu1 %v3336_v3  ;;  %v1219_v49 = vadd.f32 %v1218_v42, %v1166_v39  ;;  %v3147_v14 = vpack.c.bf16 %v2052_v1, %v2051_v0  ;;  %v2054_v17 = vld [vmem:[%s4973_s1 + $0x4c8] sm:$0xff]  ;;  %v2055_v34 = vld [vmem:[%s4973_s1 + $0x4d0] sm:$0xff]  ;;  %v1948_v43 = vld [vmem:[%s4973_s1 + $0x178] sm:$0xff] }
  0x48   :  { %3127 = vmatpush3.bf16.msra.mxu0 %v3126_v19  ;;  %v118_v19 = vadd.f32 %v117_v63, %v58_v5  ;;  %v441_v20 = vadd.f32 %v440_v12, %v394_v6  ;;  %v1204_v29 = vadd.f32 %v1203_v10, %v1157_v16  ;;  %v1168_v63 = vld [vmem:[%s4972_s0 + $0xc3] sm:$0xff]  ;;  %v458_v5 = vadd.f32 %v405_v61, %v404_v60  ;;  %v1944_v10 = vld [vmem:[%s4973_s1 + $0x158] sm:$0xff]  ;;  %v1169_v16 = vld [vmem:[%s4972_s0 + $0xcb] sm:$0xff] }
  0x49   :  { %3128 = vmatprep.subr.bf16.mxu0 %v3336_v3  ;;  %v1220_v59 = vadd.f32 %v1219_v49, %v1167_v48  ;;  %v2982_v6 = vpack.c.bf16 %v1942_v57, %v1941_v55  ;;  %v1176_v21 = vld [vmem:[%s4972_s0 + $0x103] sm:$0xff]  ;;  %v1947_v42 = vld [vmem:[%s4973_s1 + $0x170] sm:$0xff]  ;;  %v1171_v48 = vld [vmem:[%s4972_s0 + $0xdb] sm:$0xff] }
  0x4a   :  { %2965 = vmatpush3.bf16.msra.mxu1 %v2964_v28  ;;  %v1938_v28 = vld [vmem:[%s4973_s1 + $0x128] sm:$0xff]  ;;  %v120_v36 = vadd.f32 %v119_v23, %v118_v19  ;;  %v442_v38 = vadd.f32 %v441_v20, %v395_v24  ;;  %v1205_v45 = vadd.f32 %v1204_v29, %v1158_v33  ;;  %v459_v20 = vadd.f32 %v458_v5, %v406_v8  ;;  %v399_v24 = vld [vmem:[%s4972_s0 + $0x59] sm:$0xff] }
  0x4b   :  { %2966 = vmatprep.subr.bf16.mxu1 %v3336_v3  ;;  %v2976_v40 = vpack.c.bf16 %v1938_v28, %v1937_v27  ;;  %v1221_v13 = vadd.f32 %v1220_v59, %v1168_v63  ;;  %v2985_v23 = vpack.c.bf16 %v1944_v10, %v1943_v9  ;;  %v1946_v27 = vld [vmem:[%s4973_s1 + $0x168] sm:$0xff]  ;;  %v1178_v33 = vld [vmem:[%s4972_s0 + $0x113] sm:$0xff]  ;;  %v1179_v49 = vld [vmem:[%s4972_s0 + $0x11b] sm:$0xff]  ;;  %v2991_v55 = vpack.c.bf16 %v1948_v43, %v1947_v42 }
  0x4c   :  { %3130 = vmatpush3.bf16.msra.mxu0 %v3129_v37  ;;  %v1159_v37 = vld [vmem:[%s4972_s0 + $0x7b] sm:$0xf]  ;;  %v121_v52 = vrot.slane %v120_v36, 4  ;;  %v443_v53 = vadd.f32 %v442_v38, %v396_v41  ;;  %v460_v38 = vadd.f32 %v459_v20, %v407_v25  ;;  %v408_v41 = vld [vmem:[%s4972_s0 + $0xa1] sm:$0xff]  ;;  %v409_v57 = vld [vmem:[%s4972_s0 + $0xa9] sm:$0xff] }
  0x4d   :  { %3131 = vmatprep.subr.bf16.mxu0 %v3336_v3  ;;  %v1206_v47 = vsel %vm74_vm1, %v1159_v37, 0.0  ;;  %v1222_v29 = vadd.f32 %v1221_v13, %v1169_v16  ;;  %v1950_v59 = vld [vmem:[%s4973_s1 + $0x188] sm:$0xff]  ;;  %v402_v9 = vld [vmem:[%s4972_s0 + $0x71] sm:$0xff] }
  0x4e   :  { %2968 = vmatpush3.bf16.msra.mxu1 %v2967_v46  ;;  %v3141_v46 = vpack.c.bf16 %v2048_v35, %v2047_v32  ;;  %v1207_v58 = vadd.f32 %v1206_v47, %v1205_v45  ;;  %v1170_v32 = vld [vmem:[%s4972_s0 + $0xd3] sm:$0xff]  ;;  %v1172_v0 = vld [vmem:[%s4972_s0 + $0xe3] sm:$0xff]  ;;  %v1181_v20 = vld [vmem:[%s4972_s0 + $0x12b] sm:$0xff] }
  0x4f   :  { %2969 = vmatprep.subr.bf16.mxu1 %v3336_v3  ;;  %v2056_v35 = vld [vmem:[%s4973_s1 + $0x4d8] sm:$0xff]  ;;  %v1223_v45 = vadd.f32 %v1222_v29, %v1170_v32  ;;  %v1180_v1 = vld [vmem:[%s4972_s0 + $0x123] sm:$0xff]  ;;  %v1951_v13 = vld [vmem:[%s4973_s1 + $0x190] sm:$0xff] }
  0x50   :  { %3133 = vmatpush3.bf16.msra.mxu0 %v3132_v56  ;;  %v397_v56 = vld [vmem:[%s4972_s0 + $0x49] sm:$0xff]  ;;  %v1208_v12 = vrot.slane %v1207_v58, 4  ;;  %v3153_v47 = vpack.c.bf16 %v2056_v35, %v2055_v34  ;;  %v410_v10 = vld [vmem:[%s4972_s0 + $0xb1] sm:$0xff]  ;;  %v1953_v29 = vld [vmem:[%s4973_s1 + $0x1a0] sm:$0xff] }
  0x51   :  { %3134 = vmatprep.subr.bf16.mxu0 %v3336_v3  ;;  %2464 = vmatmul.mubr.f32.vlgmr.msra.gmra.mrb[0].mxu1 %v82_v62  ;;  %v3144_v62 = vpack.c.bf16 %v2050_v51, %v2049_v50  ;;  %v444_v4 = vadd.f32 %v443_v53, %v397_v56  ;;  %v2057_v50 = vld [vmem:[%s4973_s1 + $0x4e0] sm:$0xff]  ;;  %v2058_v51 = vld [vmem:[%s4973_s1 + $0x4e8] sm:$0xff]  ;;  %v1224_v61 = vadd.f32 %v1223_v45, %v1171_v48  ;;  %v1174_v34 = vld [vmem:[%s4972_s0 + $0xf3] sm:$0xff] }
  0x52   :  { %2971 = vmatpush3.bf16.msra.mxu1 %v2970_v2  ;;  %2498 = vmatprep.mubr.msk.f32.mxu1 %vm3337_vm0, %v3338_v11  ;;  %v122_v2 = vadd.f32 %v121_v52, %v120_v36  ;;  %v1209_v28 = vadd.f32 %v1208_v12, %v1207_v58  ;;  %v401_v56 = vld [vmem:[%s4972_s0 + $0x69] sm:$0xff]  ;;  %v1949_v58 = vld [vmem:[%s4973_s1 + $0x180] sm:$0xff]  ;;  %v3156_v63 = vpack.c.bf16 %v2058_v51, %v2057_v50  ;;  %v1182_v35 = vld [vmem:[%s4972_s0 + $0x133] sm:$0xff] }
  0x53   :  { %2972 = vmatprep.subr.bf16.mxu1 %v3336_v3  ;;  %v445_v19 = vadd.f32 %v444_v4, %v398_v7  ;;  %v2060_v4 = vld [vmem:[%s4973_s1 + $0x4f8] sm:$0xff]  ;;  %v2994_v8 = vpack.c.bf16 %v1950_v59, %v1949_v58  ;;  %v1225_v16 = vadd.f32 %v1224_v61, %v1172_v0  ;;  %v412_v42 = vld [vmem:[%s4972_s0 + $0xc1] sm:$0xff]  ;;  %v1955_v43 = vld [vmem:[%s4973_s1 + $0x1b0] sm:$0xff] }
  0x54   :  { %3136 = vmatpush3.bf16.msra.mxu0 %v3135_v15  ;;  %v2053_v15 = vld [vmem:[%s4973_s1 + $0x4c0] sm:$0xff]  ;;  %v123_v18 = vrot.slane %v122_v2, 2  ;;  %v1210_v44 = vrot.slane %v1209_v28, 2  ;;  %v2066_v51 = vld [vmem:[%s4973_s1 + $0x528] sm:$0xff]  ;;  %v2067_v0 = vld [vmem:[%s4973_s1 + $0x530] sm:$0xff] }
  0x55   :  { %3137 = vmatprep.subr.bf16.mxu0 %v3336_v3  ;;  %v446_v37 = vadd.f32 %v445_v19, %v399_v24  ;;  %v1173_v19 = vld [vmem:[%s4972_s0 + $0xeb] sm:$0xff]  ;;  %v2065_v50 = vld [vmem:[%s4973_s1 + $0x520] sm:$0xff] }
  0x56   :  { %2974 = vmatpush3.bf16.msra.mxu1 %v2973_v22  ;;  %v1177_v22 = vld [vmem:[%s4972_s0 + $0x10b] sm:$0xff]  ;;  %v124_v36 = vadd.f32 %v123_v18, %v122_v2  ;;  %v1211_v60 = vadd.f32 %v1210_v44, %v1209_v28  ;;  %v1956_v44 = vld [vmem:[%s4973_s1 + $0x1b8] sm:$0xff]  ;;  %v1957_v58 = vld [vmem:[%s4973_s1 + $0x1c0] sm:$0xff] }
  0x57   :  { %2709 = vmatmul.mubr.f32.vlgmr.msra.gmra.mrb[0].mxu0 %v879_v26  ;;  %2975 = vmatprep.subr.bf16.mxu1 %v3336_v3  ;;  %v1945_v26 = vld [vmem:[%s4973_s1 + $0x160] sm:$0xff]  ;;  %v1236_v30 = vadd.f32 %v1177_v22, %v1176_v21  ;;  %v2059_v2 = vld [vmem:[%s4973_s1 + $0x4f0] sm:$0xff]  ;;  %v2062_v22 = vld [vmem:[%s4973_s1 + $0x508] sm:$0xff] }
  0x58   :  { %3139 = vmatpush3.bf16.msra.mxu0 %v3138_v31  ;;  %2743 = vmatprep.mubr.msk.f32.mxu0 %vm3337_vm0, %v3338_v11  ;;  %v3150_v31 = vpack.c.bf16 %v2054_v17, %v2053_v15  ;;  %v2988_v39 = vpack.c.bf16 %v1946_v27, %v1945_v26  ;;  %v125_v52 = vrot.slane %v124_v36, 1  ;;  %v1212_v12 = vrot.slane %v1211_v60, 1  ;;  %v403_v15 = vld [vmem:[%s4972_s0 + $0x79] sm:$0xf]  ;;  %v2061_v21 = vld [vmem:[%s4973_s1 + $0x500] sm:$0xff]  ;;  %v1958_v59 = vld [vmem:[%s4973_s1 + $0x1c8] sm:$0xff] }
  0x59   :  { %3140 = vmatprep.subr.bf16.mxu0 %v3336_v3  ;;  %v3159_v18 = vpack.c.bf16 %v2060_v4, %v2059_v2  ;;  %v450_v26 = vsel %vm74_vm1, %v403_v15, 0.0  ;;  %v411_v27 = vld [vmem:[%s4972_s0 + $0xb9] sm:$0xff]  ;;  %v1185_v15 = vld [vmem:[%s4972_s0 + $0x14b] sm:$0xff] }
  0x5a   :  { %2977 = vmatpush3.bf16.msra.mxu1 %v2976_v40  ;;  %v400_v40 = vld [vmem:[%s4972_s0 + $0x61] sm:$0xff]  ;;  %v126_v5 = vadd.f32 %v125_v52, %v124_v36  ;;  %v1213_v28 = vadd.f32 %v1212_v12, %v1211_v60  ;;  %v2063_v36 = vld [vmem:[%s4973_s1 + $0x510] sm:$0xff] }
  0x5b   :  { %2978 = vmatprep.subr.bf16.mxu1 %v3336_v3  ;;  %v447_v53 = vadd.f32 %v446_v37, %v400_v40  ;;  %v2064_v37 = vld [vmem:[%s4973_s1 + $0x518] sm:$0xff] }
  0x5c   :  { %3142 = vmatpush3.bf16.msra.mxu0 %v3141_v46  ;;  %v1237_v46 = vadd.f32 %v1236_v30, %v1178_v33  ;;  %v1954_v30 = vld [vmem:[%s4973_s1 + $0x1a8] sm:$0xff]  ;;  %v3162_v33 = vpack.c.bf16 %v2062_v22, %v2061_v21 }
  0x5d   :  { %3143 = vmatprep.subr.bf16.mxu0 %v3336_v3 }
  0x5e   :  { %2980 = vmatpush3.bf16.msra.mxu1 %v2979_v54  ;;  %v461_v54 = vadd.f32 %v460_v38, %v408_v41  ;;  %v3000_v41 = vpack.c.bf16 %v1954_v30, %v1953_v29 }
  0x5f   :  { %2981 = vmatprep.subr.bf16.mxu1 %v3336_v3 }
  0x60   :  { %3145 = vmatpush3.bf16.msra.mxu0 %v3144_v62  ;;  %v1238_v62 = vadd.f32 %v1237_v46, %v1179_v49  ;;  %v462_v7 = vadd.f32 %v461_v54, %v409_v57  ;;  %v1183_v49 = vld [vmem:[%s4972_s0 + $0x13b] sm:$0xff]  ;;  %v3003_v54 = vpack.c.bf16 %v1956_v44, %v1955_v43  ;;  %v421_v57 = vld [vmem:[%s4972_s0 + $0x109] sm:$0xff] }
  0x61   :  { %3146 = vmatprep.subr.bf16.mxu0 %v3336_v3  ;;  %v1964_v43 = vld [vmem:[%s4973_s1 + $0x1f8] sm:$0xff] }
  0x62   :  { %2983 = vmatpush3.bf16.msra.mxu1 %v2982_v6  ;;  %v448_v6 = vadd.f32 %v447_v53, %v401_v56  ;;  %v1239_v17 = vadd.f32 %v1238_v62, %v1180_v1  ;;  %v463_v24 = vadd.f32 %v462_v7, %v410_v10  ;;  %v420_v56 = vld [vmem:[%s4972_s0 + $0x101] sm:$0xff]  ;;  %v3168_v62 = vpack.c.bf16 %v2066_v51, %v2065_v50  ;;  %v2068_v1 = vld [vmem:[%s4973_s1 + $0x538] sm:$0xff] }
  0x63   :  { %2984 = vmatprep.subr.bf16.mxu1 %v3336_v3  ;;  %v414_v7 = vld [vmem:[%s4972_s0 + $0xd1] sm:$0xff]  ;;  %v2073_v50 = vld [vmem:[%s4973_s1 + $0x560] sm:$0xff]  ;;  %v2074_v51 = vld [vmem:[%s4973_s1 + $0x568] sm:$0xff] }
  0x64   :  { %3148 = vmatpush3.bf16.msra.mxu0 %v3147_v14  ;;  %v1952_v14 = vld [vmem:[%s4973_s1 + $0x198] sm:$0xff]  ;;  %v1240_v32 = vadd.f32 %v1239_v17, %v1181_v20  ;;  %v464_v40 = vadd.f32 %v463_v24, %v411_v27  ;;  %v1523_v17 = vld [vmem:[%s4972_s0 + $0xc] sm:$0xff] }
  0x65   :  { %3149 = vmatprep.subr.bf16.mxu0 %v3336_v3  ;;  %v2997_v25 = vpack.c.bf16 %v1952_v14, %v1951_v13  ;;  %v1960_v10 = vld [vmem:[%s4973_s1 + $0x1d8] sm:$0xff]  ;;  %v3171_v14 = vpack.c.bf16 %v2068_v1, %v2067_v0  ;;  %v1962_v27 = vld [vmem:[%s4973_s1 + $0x1e8] sm:$0xff] }
  0x66   :  { %2986 = vmatpush3.bf16.msra.mxu1 %v2985_v23  ;;  %v449_v23 = vadd.f32 %v448_v6, %v402_v9  ;;  %v1241_v46 = vadd.f32 %v1240_v32, %v1182_v35  ;;  %v465_v53 = vadd.f32 %v464_v40, %v412_v42  ;;  %v3006_v6 = vpack.c.bf16 %v1958_v59, %v1957_v58  ;;  %v1959_v9 = vld [vmem:[%s4973_s1 + $0x1d0] sm:$0xff]  ;;  %v415_v24 = vld [vmem:[%s4972_s0 + $0xd9] sm:$0xff]  ;;  %v416_v40 = vld [vmem:[%s4972_s0 + $0xe1] sm:$0xff] }
  0x67   :  { %2987 = vmatprep.subr.bf16.mxu1 %v3336_v3  ;;  %v1186_v32 = vld [vmem:[%s4972_s0 + $0x153] sm:$0xff]  ;;  %v1965_v58 = vld [vmem:[%s4973_s1 + $0x200] sm:$0xff]  ;;  %v1966_v59 = vld [vmem:[%s4973_s1 + $0x208] sm:$0xff] }
  0x68   :  { %3151 = vmatpush3.bf16.msra.mxu0 %v3150_v31  ;;  %v1226_v31 = vadd.f32 %v1225_v16, %v1173_v19  ;;  %v451_v38 = vadd.f32 %v450_v26, %v449_v23  ;;  %v1242_v61 = vadd.f32 %v1241_v46, %v1183_v49  ;;  %v1522_v16 = vld [vmem:[%s4972_s0 + $0x4] sm:$0xff]  ;;  %v3009_v23 = vpack.c.bf16 %v1960_v10, %v1959_v9  ;;  %v2072_v35 = vld [vmem:[%s4973_s1 + $0x558] sm:$0xff]  ;;  %v1963_v42 = vld [vmem:[%s4973_s1 + $0x1f0] sm:$0xff] }
  0x69   :  { %3152 = vmatprep.subr.bf16.mxu0 %v3336_v3  ;;  %v2070_v19 = vld [vmem:[%s4973_s1 + $0x548] sm:$0xff]  ;;  %v1961_v26 = vld [vmem:[%s4973_s1 + $0x1e0] sm:$0xff]  ;;  %v1570_v30 = vadd.f32 %v1523_v17, %v1522_v16  ;;  %v418_v9 = vld [vmem:[%s4972_s0 + $0xf1] sm:$0xff] }
  0x6a   :  { %2989 = vmatpush3.bf16.msra.mxu1 %v2988_v39  ;;  %v1175_v39 = vld [vmem:[%s4972_s0 + $0xfb] sm:$0xf]  ;;  %v1227_v45 = vadd.f32 %v1226_v31, %v1174_v34  ;;  %v452_v52 = vrot.slane %v451_v38, 4  ;;  %v2071_v34 = vld [vmem:[%s4973_s1 + $0x550] sm:$0xff]  ;;  %v1188_v0 = vld [vmem:[%s4972_s0 + $0x163] sm:$0xff] }
  0x6b   :  { %2990 = vmatprep.subr.bf16.mxu1 %v3336_v3  ;;  %v1228_v48 = vsel %vm74_vm1, %v1175_v39, 0.0  ;;  %v3012_v39 = vpack.c.bf16 %v1962_v27, %v1961_v26  ;;  %v1525_v49 = vld [vmem:[%s4972_s0 + $0x1c] sm:$0xff]  ;;  %v1526_v1 = vld [vmem:[%s4972_s0 + $0x24] sm:$0xff]  ;;  %v426_v10 = vld [vmem:[%s4972_s0 + $0x131] sm:$0xff] }
  0x6c   :  { %3154 = vmatpush3.bf16.msra.mxu0 %v3153_v47  ;;  %v3165_v47 = vpack.c.bf16 %v2064_v37, %v2063_v36  ;;  %v1229_v60 = vadd.f32 %v1228_v48, %v1227_v45  ;;  %v453_v2 = vadd.f32 %v452_v52, %v451_v38  ;;  %v1187_v48 = vld [vmem:[%s4972_s0 + $0x15b] sm:$0xff] }
  0x6d   :  { %3155 = vmatprep.subr.bf16.mxu0 %v3336_v3  ;;  %v427_v27 = vld [vmem:[%s4972_s0 + $0x139] sm:$0xff] }
  0x6e   :  { %2992 = vmatpush3.bf16.msra.mxu1 %v2991_v55  ;;  %v413_v55 = vld [vmem:[%s4972_s0 + $0xc9] sm:$0xff]  ;;  %v1230_v12 = vrot.slane %v1229_v60, 4  ;;  %v454_v20 = vrot.slane %v453_v2, 2 }
  0x6f   :  { %2993 = vmatprep.subr.bf16.mxu1 %v3336_v3  ;;  %v466_v4 = vadd.f32 %v465_v53, %v413_v55  ;;  %v3015_v55 = vpack.c.bf16 %v1964_v43, %v1963_v42  ;;  %v428_v42 = vld [vmem:[%s4972_s0 + $0x141] sm:$0xff]  ;;  %v1971_v43 = vld [vmem:[%s4973_s1 + $0x230] sm:$0xff] }
  0x70   :  { %3157 = vmatpush3.bf16.msra.mxu0 %v3156_v63  ;;  %v1184_v63 = vld [vmem:[%s4972_s0 + $0x143] sm:$0xff]  ;;  %v455_v36 = vadd.f32 %v454_v20, %v453_v2  ;;  %v2075_v2 = vld [vmem:[%s4973_s1 + $0x570] sm:$0xff] }
  0x71   :  { %3158 = vmatprep.subr.bf16.mxu0 %v3336_v3  ;;  %2499 = vmatmul.mubr.f32.vlgmr.msra.gmra.mrb[0].mxu1 %v126_v5  ;;  %v480_v5 = vadd.f32 %v421_v57, %v420_v56  ;;  %v1243_v13 = vadd.f32 %v1242_v61, %v1184_v63  ;;  %v467_v21 = vadd.f32 %v466_v4, %v414_v7  ;;  %v417_v56 = vld [vmem:[%s4972_s0 + $0xe9] sm:$0xff]  ;;  %v2076_v4 = vld [vmem:[%s4973_s1 + $0x578] sm:$0xff] }
  0x72   :  { %2995 = vmatpush3.bf16.msra.mxu1 %v2994_v8  ;;  %2533 = vmatprep.mubr.msk.f32.mxu1 %vm3337_vm0, %v3338_v11  ;;  %v422_v8 = vld [vmem:[%s4972_s0 + $0x111] sm:$0xff]  ;;  %v456_v52 = vrot.slane %v455_v36, 1  ;;  %v425_v57 = vld [vmem:[%s4972_s0 + $0x129] sm:$0xff]  ;;  %v3180_v63 = vpack.c.bf16 %v2074_v51, %v2073_v50  ;;  %v2081_v50 = vld [vmem:[%s4973_s1 + $0x5a0] sm:$0xff] }
  0x73   :  { %2996 = vmatprep.subr.bf16.mxu1 %v3336_v3  ;;  %v481_v22 = vadd.f32 %v480_v5, %v422_v8  ;;  %v1244_v29 = vadd.f32 %v1243_v13, %v1185_v15  ;;  %v468_v37 = vadd.f32 %v467_v21, %v415_v24  ;;  %v3018_v8 = vpack.c.bf16 %v1966_v59, %v1965_v58  ;;  %v1967_v13 = vld [vmem:[%s4973_s1 + $0x210] sm:$0xff]  ;;  %v419_v15 = vld [vmem:[%s4972_s0 + $0xf9] sm:$0xf]  ;;  %v2077_v21 = vld [vmem:[%s4973_s1 + $0x580] sm:$0xff] }
  0x74   :  { %3160 = vmatpush3.bf16.msra.mxu0 %v3159_v18  ;;  %v2069_v18 = vld [vmem:[%s4973_s1 + $0x540] sm:$0xff]  ;;  %v457_v5 = vadd.f32 %v456_v52, %v455_v36  ;;  %v1527_v20 = vld [vmem:[%s4972_s0 + $0x2c] sm:$0xff]  ;;  %v472_v26 = vsel %vm74_vm1, %v419_v15, 0.0 }
  0x75   :  { %3161 = vmatprep.subr.bf16.mxu0 %v3336_v3  ;;  %v3174_v31 = vpack.c.bf16 %v2070_v19, %v2069_v18  ;;  %v1245_v45 = vadd.f32 %v1244_v29, %v1186_v32  ;;  %v469_v53 = vadd.f32 %v468_v37, %v416_v40  ;;  %v3183_v18 = vpack.c.bf16 %v2076_v4, %v2075_v2  ;;  %v1189_v19 = vld [vmem:[%s4972_s0 + $0x16b] sm:$0xff]  ;;  %v1969_v29 = vld [vmem:[%s4973_s1 + $0x220] sm:$0xff]  ;;  %v2080_v37 = vld [vmem:[%s4973_s1 + $0x598] sm:$0xff] }
  0x76   :  { %2998 = vmatpush3.bf16.msra.mxu1 %v2997_v25  ;;  %v423_v25 = vld [vmem:[%s4972_s0 + $0x119] sm:$0xff]  ;;  %v2079_v36 = vld [vmem:[%s4973_s1 + $0x590] sm:$0xff]  ;;  %v2082_v51 = vld [vmem:[%s4973_s1 + $0x5a8] sm:$0xff] }
  0x77   :  { %2744 = vmatmul.mubr.f32.vlgmr.msra.gmra.mrb[0].mxu0 %v1213_v28  ;;  %2999 = vmatprep.subr.bf16.mxu1 %v3336_v3  ;;  %v1231_v28 = vadd.f32 %v1230_v12, %v1229_v60  ;;  %v482_v38 = vadd.f32 %v481_v22, %v423_v25  ;;  %v1246_v61 = vadd.f32 %v1245_v45, %v1187_v48  ;;  %v2078_v22 = vld [vmem:[%s4973_s1 + $0x588] sm:$0xff]  ;;  %v1973_v58 = vld [vmem:[%s4973_s1 + $0x240] sm:$0xff] }
  0x78   :  { %3163 = vmatpush3.bf16.msra.mxu0 %v3162_v33  ;;  %2778 = vmatprep.mubr.msk.f32.mxu0 %vm3337_vm0, %v3338_v11  ;;  %v1524_v33 = vld [vmem:[%s4972_s0 + $0x14] sm:$0xff]  ;;  %v1974_v59 = vld [vmem:[%s4973_s1 + $0x248] sm:$0xff] }
  0x79   :  { %3164 = vmatprep.subr.bf16.mxu0 %v3336_v3  ;;  %v1232_v44 = vrot.slane %v1231_v28, 2  ;;  %v1571_v46 = vadd.f32 %v1570_v30, %v1524_v33  ;;  %v1247_v16 = vadd.f32 %v1246_v61, %v1188_v0  ;;  %v1970_v30 = vld [vmem:[%s4973_s1 + $0x228] sm:$0xff]  ;;  %v3186_v33 = vpack.c.bf16 %v2078_v22, %v2077_v21 }
  0x7a   :  { %3001 = vmatpush3.bf16.msra.mxu1 %v3000_v41  ;;  %v424_v41 = vld [vmem:[%s4972_s0 + $0x121] sm:$0xff] }
  0x7b   :  { %3002 = vmatprep.subr.bf16.mxu1 %v3336_v3  ;;  %v1233_v60 = vadd.f32 %v1232_v44, %v1231_v28  ;;  %v1972_v44 = vld [vmem:[%s4973_s1 + $0x238] sm:$0xff] }
  0x7c   :  { %3166 = vmatpush3.bf16.msra.mxu0 %v3165_v47  ;;  %v3177_v47 = vpack.c.bf16 %v2072_v35, %v2071_v34  ;;  %v1190_v34 = vld [vmem:[%s4972_s0 + $0x173] sm:$0xff] }
  0x7d   :  { %3167 = vmatprep.subr.bf16.mxu0 %v3336_v3  ;;  %v1234_v12 = vrot.slane %v1233_v60, 1  ;;  %v1528_v35 = vld [vmem:[%s4972_s0 + $0x34] sm:$0xff] }
  0x7e   :  { %3004 = vmatpush3.bf16.msra.mxu1 %v3003_v54  ;;  %v483_v54 = vadd.f32 %v482_v38, %v424_v41  ;;  %v3024_v41 = vpack.c.bf16 %v1970_v30, %v1969_v29 }
  0x7f   :  { %3005 = vmatprep.subr.bf16.mxu1 %v3336_v3  ;;  %v1235_v28 = vadd.f32 %v1234_v12, %v1233_v60 }
  0x80   :  { %3169 = vmatpush3.bf16.msra.mxu0 %v3168_v62  ;;  %v1572_v62 = vadd.f32 %v1571_v46, %v1525_v49  ;;  %v484_v7 = vadd.f32 %v483_v54, %v425_v57  ;;  %v1529_v49 = vld [vmem:[%s4972_s0 + $0x3c] sm:$0xff]  ;;  %v3027_v54 = vpack.c.bf16 %v1972_v44, %v1971_v43  ;;  %v767_v57 = vld [vmem:[%s4972_s0 + $0xa] sm:$0xff] }
  0x81   :  { %3170 = vmatprep.subr.bf16.mxu0 %v3336_v3 }
  0x82   :  { %3007 = vmatpush3.bf16.msra.mxu1 %v3006_v6  ;;  %v470_v6 = vadd.f32 %v469_v53, %v417_v56  ;;  %v1573_v17 = vadd.f32 %v1572_v62, %v1526_v1  ;;  %v485_v24 = vadd.f32 %v484_v7, %v426_v10  ;;  %v766_v56 = vld [vmem:[%s4972_s0 + $0x2] sm:$0xff] }
  0x83   :  { %3008 = vmatprep.subr.bf16.mxu1 %v3336_v3 }
  0x84   :  { %3172 = vmatpush3.bf16.msra.mxu0 %v3171_v14  ;;  %v1968_v14 = vld [vmem:[%s4973_s1 + $0x218] sm:$0xff]  ;;  %v1574_v32 = vadd.f32 %v1573_v17, %v1527_v20  ;;  %v486_v40 = vadd.f32 %v485_v24, %v427_v27 }
  0x85   :  { %3173 = vmatprep.subr.bf16.mxu0 %v3336_v3  ;;  %v3021_v25 = vpack.c.bf16 %v1968_v14, %v1967_v13 }
  0x86   :  { %3010 = vmatpush3.bf16.msra.mxu1 %v3009_v23  ;;  %v471_v23 = vadd.f32 %v470_v6, %v418_v9  ;;  %v1575_v46 = vadd.f32 %v1574_v32, %v1528_v35  ;;  %v487_v53 = vadd.f32 %v486_v40, %v428_v42 }
  0x87   :  { %3011 = vmatprep.subr.bf16.mxu1 %v3336_v3 }
  0x88   :  { %3175 = vmatpush3.bf16.msra.mxu0 %v3174_v31  ;;  %v1248_v31 = vadd.f32 %v1247_v16, %v1189_v19  ;;  %v473_v38 = vadd.f32 %v472_v26, %v471_v23  ;;  %v1576_v61 = vadd.f32 %v1575_v46, %v1529_v49 }
  0x89   :  { %3176 = vmatprep.subr.bf16.mxu0 %v3336_v3 }
  0x8a   :  { %3013 = vmatpush3.bf16.msra.mxu1 %v3012_v39  ;;  %v1191_v39 = vld [vmem:[%s4972_s0 + $0x17b] sm:$0xf]  ;;  %v1249_v45 = vadd.f32 %v1248_v31, %v1190_v34  ;;  %v474_v52 = vrot.slane %v473_v38, 4 }
  0x8b   :  { %3014 = vmatprep.subr.bf16.mxu1 %v3336_v3  ;;  %v1250_v48 = vsel %vm74_vm1, %v1191_v39, 0.0 }
  0x8c   :  { %3178 = vmatpush3.bf16.msra.mxu0 %v3177_v47  ;;  %v3189_v47 = vpack.c.bf16 %v2080_v37, %v2079_v36  ;;  %v1251_v60 = vadd.f32 %v1250_v48, %v1249_v45 }
  0x8d   :  { %3179 = vmatprep.subr.bf16.mxu0 %v3336_v3 }
  0x8e   :  { %3016 = vmatpush3.bf16.msra.mxu1 %v3015_v55  ;;  %v429_v55 = vld [vmem:[%s4972_s0 + $0x149] sm:$0xff] }
  0x8f   :  { %3017 = vmatprep.subr.bf16.mxu1 %v3336_v3 }
  0x90   :  { %3181 = vmatpush3.bf16.msra.mxu0 %v3180_v63 }
  0x91   :  { %3182 = vmatprep.subr.bf16.mxu0 %v3336_v3  ;;  %2534 = vmatmul.mubr.f32.vlgmr.msra.gmra.mrb[0].mxu1 %v457_v5 }
  0x92   :  { %3019 = vmatpush3.bf16.msra.mxu1 %v3018_v8  ;;  %2568 = vmatprep.mubr.msk.f32.mxu1 %vm3337_vm0, %v3338_v11 }
  0x93   :  { %3020 = vmatprep.subr.bf16.mxu1 %v3336_v3 }
  0x94   :  { %3184 = vmatpush3.bf16.msra.mxu0 %v3183_v18 }
  0x95   :  { %3185 = vmatprep.subr.bf16.mxu0 %v3336_v3 }
  0x96   :  { %3022 = vmatpush3.bf16.msra.mxu1 %v3021_v25 }
  0x97   :  { %2779 = vmatmul.mubr.f32.vlgmr.msra.gmra.mrb[0].mxu0 %v1235_v28  ;;  %3023 = vmatprep.subr.bf16.mxu1 %v3336_v3 }
  0x98   :  { %3187 = vmatpush3.bf16.msra.mxu0 %v3186_v33  ;;  %2813 = vmatprep.mubr.msk.f32.mxu0 %vm3337_vm0, %v3338_v11 }
  0x99   :  { %3188 = vmatprep.subr.bf16.mxu0 %v3336_v3 }
  0x9a   :  { %3025 = vmatpush3.bf16.msra.mxu1 %v3024_v41 }
  0x9b   :  { %3026 = vmatprep.subr.bf16.mxu1 %v3336_v3 }
  0x9c   :  { %7 = vsyncpa [#allocation3], 0  ;;  %3190 = vmatpush3.bf16.msra.mxu0 %v3189_v47  ;;  %v3192_v62 = vpack.c.bf16 %v2082_v51, %v2081_v50  ;;  %v1530_v63 = vld [vmem:[%s4972_s0 + $0x44] sm:$0xff]  ;;  %v2083_v0 = vld [vmem:[%s4973_s1 + $0x5b0] sm:$0xff]  ;;  %v475_v2 = vadd.f32 %v474_v52, %v473_v38  ;;  %v488_v4 = vadd.f32 %v487_v53, %v429_v55  ;;  %v814_v5 = vadd.f32 %v767_v57, %v766_v56  ;;  %s3339_s16 = smov [#allocation2]  }
  0x9d   :  { %3191 = vmatprep.subr.bf16.mxu0 %v3336_v3  ;;  %v2084_v1 = vld [vmem:[%s4973_s1 + $0x5b8] sm:$0xff]  ;;  %v3030_v6 = vpack.c.bf16 %v1974_v59, %v1973_v58  ;;  %v1975_v9 = vld [vmem:[%s4973_s1 + $0x250] sm:$0xff]  ;;  %v1252_v12 = vrot.slane %v1251_v60, 4  ;;  %v1577_v13 = vadd.f32 %v1576_v61, %v1530_v63  ;;  %v1538_v16 = vld [vmem:[%s4972_s0 + $0x84] sm:$0xff]  ;;  %s1909_s17 = sshll.u32 %s3339_s16, 4  ;;  %vm1901_vm2 = vcmask 73728   ;;  %s1910_s17 = int_to_ptr.vmem [resolvable:$true] %s1909_s17 }
  0x9e   :  { %3028 = vmatpush3.bf16.msra.mxu1 %v3027_v54  ;;  %v430_v7 = vld [vmem:[%s4972_s0 + $0x151] sm:$0xff]  ;;  %v3195_v14 = vpack.c.bf16 %v2084_v1, %v2083_v0  ;;  %v2085_v18 = vld [vmem:[%s4973_s1 + $0x5c0] sm:$0xff]  ;;  %v2086_v19 = vld [vmem:[%s4973_s1 + $0x5c8] sm:$0xff]  ;;  %v476_v20 = vrot.slane %v475_v2, 2  ;;  %s3316_s18 = scalar_lea.vmem %s1910_s17, 32  ;;  %p3317_p1 = scmp.lt.s32.totalorder %s1910_s17, %s1910_s17 }
  0x9f   :  { %v768_v8 = vld [vmem:[%s4972_s0 + $0x12] sm:$0xff]  ;;  %3029 = vmatprep.subr.bf16.mxu1 %v3336_v3  ;;  %v489_v21 = vadd.f32 %v488_v4, %v430_v7  ;;  %v769_v25 = vld [vmem:[%s4972_s0 + $0x1a] sm:$0xff]  ;;  %v1978_v27 = vld [vmem:[%s4973_s1 + $0x268] sm:$0xff]  ;;  %v1253_v28 = vadd.f32 %v1252_v12, %v1251_v60  ;;  %v3198_v31 = vpack.c.bf16 %v2086_v19, %v2085_v18 }
  0xa0   :  { %v1976_v10 = vld [vmem:[%s4973_s1 + $0x258] sm:$0xff]  ;;  %3193 = vmatpush3.bf16.msra.mxu0 %v3192_v62  ;;  %v1531_v15 = vld [vmem:[%s4972_s0 + $0x4c] sm:$0xff]  ;;  %v815_v22 = vadd.f32 %v814_v5, %v768_v8  ;;  %v1977_v26 = vld [vmem:[%s4973_s1 + $0x260] sm:$0xff]  ;;  %v477_v36 = vadd.f32 %v476_v20, %v475_v2 }
  0xa1   :  { %v1539_v17 = vld [vmem:[%s4972_s0 + $0x8c] sm:$0xff]  ;;  %3194 = vmatprep.subr.bf16.mxu0 %v3336_v3  ;;  %v3033_v23 = vpack.c.bf16 %v1976_v10, %v1975_v9  ;;  %v431_v24 = vld [vmem:[%s4972_s0 + $0x159] sm:$0xff]  ;;  %v1578_v29 = vadd.f32 %v1577_v13, %v1531_v15  ;;  %v3036_v39 = vpack.c.bf16 %v1978_v27, %v1977_v26  ;;  %v432_v40 = vld [vmem:[%s4972_s0 + $0x161] sm:$0xff]  ;;  %v1254_v44 = vrot.slane %v1253_v28, 2 }
  0xa2   :  { %3031 = vmatpush3.bf16.msra.mxu1 %v3030_v6  ;;  %v1592_v30 = vadd.f32 %v1539_v17, %v1538_v16  ;;  %v1532_v32 = vld [vmem:[%s4972_s0 + $0x54] sm:$0xff]  ;;  %v490_v37 = vadd.f32 %v489_v21, %v431_v24  ;;  %v816_v38 = vadd.f32 %v815_v22, %v769_v25  ;;  %v770_v41 = vld [vmem:[%s4972_s0 + $0x22] sm:$0xff]  ;;  %v478_v52 = vrot.slane %v477_v36, 1  ;;  %v771_v57 = vld [vmem:[%s4972_s0 + $0x2a] sm:$0xff] }
  0xa3   :  { %3032 = vmatprep.subr.bf16.mxu1 %v3336_v3  ;;  %v1540_v33 = vld [vmem:[%s4972_s0 + $0x94] sm:$0xff]  ;;  %v1579_v45 = vadd.f32 %v1578_v29, %v1532_v32  ;;  %v1533_v48 = vld [vmem:[%s4972_s0 + $0x5c] sm:$0xff]  ;;  %v2090_v51 = vld [vmem:[%s4973_s1 + $0x5e8] sm:$0xff]  ;;  %v1255_v60 = vadd.f32 %v1254_v44, %v1253_v28 }
  0xa4   :  { %3196 = vmatpush3.bf16.msra.mxu0 %v3195_v14  ;;  %v2087_v34 = vld [vmem:[%s4973_s1 + $0x5d0] sm:$0xff]  ;;  %v2088_v35 = vld [vmem:[%s4973_s1 + $0x5d8] sm:$0xff]  ;;  %v1593_v46 = vadd.f32 %v1592_v30, %v1540_v33  ;;  %v2089_v50 = vld [vmem:[%s4973_s1 + $0x5e0] sm:$0xff]  ;;  %v491_v53 = vadd.f32 %v490_v37, %v432_v40  ;;  %v817_v54 = vadd.f32 %v816_v38, %v770_v41  ;;  %v479_v5 = vadd.f32 %v478_v52, %v477_v36 }
  0xa5   :  { %3197 = vmatprep.subr.bf16.mxu0 %v3336_v3  ;;  %v1979_v42 = vld [vmem:[%s4973_s1 + $0x270] sm:$0xff]  ;;  %v1980_v43 = vld [vmem:[%s4973_s1 + $0x278] sm:$0xff]  ;;  %v3201_v47 = vpack.c.bf16 %v2088_v35, %v2087_v34  ;;  %v1981_v58 = vld [vmem:[%s4973_s1 + $0x280] sm:$0xff]  ;;  %v1580_v61 = vadd.f32 %v1579_v45, %v1533_v48  ;;  %v3204_v63 = vpack.c.bf16 %v2090_v51, %v2089_v50  ;;  %v1256_v12 = vrot.slane %v1255_v60, 1 }
  0xa6   :  { %3034 = vmatpush3.bf16.msra.mxu1 %v3033_v23  ;;  %v1541_v49 = vld [vmem:[%s4972_s0 + $0x9c] sm:$0xff]  ;;  %v3039_v55 = vpack.c.bf16 %v1980_v43, %v1979_v42  ;;  %v433_v56 = vld [vmem:[%s4972_s0 + $0x169] sm:$0xff]  ;;  %v818_v7 = vadd.f32 %v817_v54, %v771_v57  ;;  %v434_v9 = vld [vmem:[%s4972_s0 + $0x171] sm:$0xff] }
  0xa7   :  { %3035 = vmatprep.subr.bf16.mxu1 %v3336_v3  ;;  %v1982_v59 = vld [vmem:[%s4973_s1 + $0x288] sm:$0xff]  ;;  %v1594_v62 = vadd.f32 %v1593_v46, %v1541_v49  ;;  %v2091_v2 = vld [vmem:[%s4973_s1 + $0x5f0] sm:$0xff]  ;;  %v2092_v4 = vld [vmem:[%s4973_s1 + $0x5f8] sm:$0xff]  ;;  %v492_v6 = vadd.f32 %v491_v53, %v433_v56  ;;  %v1257_v28 = vadd.f32 %v1256_v12, %v1255_v60 }
  0xa8   :  { %3199 = vmatpush3.bf16.msra.mxu0 %v3198_v31  ;;  %v1534_v0 = vld [vmem:[%s4972_s0 + $0x64] sm:$0xff]  ;;  %v3042_v8 = vpack.c.bf16 %v1982_v59, %v1981_v58  ;;  %v772_v10 = vld [vmem:[%s4972_s0 + $0x32] sm:$0xff]  ;;  %v3207_v18 = vpack.c.bf16 %v2092_v4, %v2091_v2  ;;  %v773_v27 = vld [vmem:[%s4972_s0 + $0x3a] sm:$0xff] }
  0xa9   :  { %3200 = vmatprep.subr.bf16.mxu0 %v3336_v3  ;;  %v1542_v1 = vld [vmem:[%s4972_s0 + $0xa4] sm:$0xff]  ;;  %v1983_v13 = vld [vmem:[%s4973_s1 + $0x290] sm:$0xff]  ;;  %v1984_v14 = vld [vmem:[%s4973_s1 + $0x298] sm:$0xff]  ;;  %v1581_v16 = vadd.f32 %v1580_v61, %v1534_v0  ;;  %v493_v23 = vadd.f32 %v492_v6, %v434_v9  ;;  %v819_v24 = vadd.f32 %v818_v7, %v772_v10 }
  0xaa   :  { %3037 = vmatpush3.bf16.msra.mxu1 %v3036_v39  ;;  %v435_v15 = vld [vmem:[%s4972_s0 + $0x179] sm:$0xf]  ;;  %v1595_v17 = vadd.f32 %v1594_v62, %v1542_v1  ;;  %v1535_v19 = vld [vmem:[%s4972_s0 + $0x6c] sm:$0xff]  ;;  %v2093_v21 = vld [vmem:[%s4973_s1 + $0x600] sm:$0xff]  ;;  %v3045_v25 = vpack.c.bf16 %v1984_v14, %v1983_v13 }
  0xab   :  { %3038 = vmatprep.subr.bf16.mxu1 %v3336_v3  ;;  %v1543_v20 = vld [vmem:[%s4972_s0 + $0xac] sm:$0xff]  ;;  %v494_v26 = vsel %vm74_vm1, %v435_v15, 0.0  ;;  %v1985_v29 = vld [vmem:[%s4973_s1 + $0x2a0] sm:$0xff]  ;;  %v1582_v31 = vadd.f32 %v1581_v16, %v1535_v19  ;;  %v1536_v34 = vld [vmem:[%s4972_s0 + $0x74] sm:$0xff]  ;;  %v820_v40 = vadd.f32 %v819_v24, %v773_v27 }
  0xac   :  { %3202 = vmatpush3.bf16.msra.mxu0 %v3201_v47  ;;  %v2094_v22 = vld [vmem:[%s4973_s1 + $0x608] sm:$0xff]  ;;  %v1596_v32 = vadd.f32 %v1595_v17, %v1543_v20  ;;  %v1544_v35 = vld [vmem:[%s4972_s0 + $0xb4] sm:$0xff]  ;;  %v495_v38 = vadd.f32 %v494_v26, %v493_v23  ;;  %v1537_v39 = vld [vmem:[%s4972_s0 + $0x7c] sm:$0xf] }
  0xad   :  { %3203 = vmatprep.subr.bf16.mxu0 %v3336_v3  ;;  %v1986_v30 = vld [vmem:[%s4973_s1 + $0x2a8] sm:$0xff]  ;;  %v3210_v33 = vpack.c.bf16 %v2094_v22, %v2093_v21  ;;  %v2095_v36 = vld [vmem:[%s4973_s1 + $0x610] sm:$0xff]  ;;  %v2096_v37 = vld [vmem:[%s4973_s1 + $0x618] sm:$0xff]  ;;  %v1583_v45 = vadd.f32 %v1582_v31, %v1536_v34  ;;  %v1584_v48 = vsel %vm74_vm1, %v1537_v39, 0.0 }
  0xae   :  { %3040 = vmatpush3.bf16.msra.mxu1 %v3039_v55  ;;  %v3048_v41 = vpack.c.bf16 %v1986_v30, %v1985_v29  ;;  %v774_v42 = vld [vmem:[%s4972_s0 + $0x42] sm:$0xff]  ;;  %v1987_v43 = vld [vmem:[%s4973_s1 + $0x2b0] sm:$0xff]  ;;  %v1988_v44 = vld [vmem:[%s4973_s1 + $0x2b8] sm:$0xff]  ;;  %v1597_v46 = vadd.f32 %v1596_v32, %v1544_v35  ;;  %v3213_v47 = vpack.c.bf16 %v2096_v37, %v2095_v36  ;;  %v496_v52 = vrot.slane %v495_v38, 4 }
  0xaf   :  { %3041 = vmatprep.subr.bf16.mxu1 %v3336_v3  ;;  %v1545_v49 = vld [vmem:[%s4972_s0 + $0xbc] sm:$0xff]  ;;  %v2098_v51 = vld [vmem:[%s4973_s1 + $0x628] sm:$0xff]  ;;  %v821_v53 = vadd.f32 %v820_v40, %v774_v42  ;;  %v3051_v54 = vpack.c.bf16 %v1988_v44, %v1987_v43  ;;  %v1585_v58 = vadd.f32 %v1584_v48, %v1583_v45  ;;  %v2099_v62 = vld [vmem:[%s4973_s1 + $0x630] sm:$0xff] }
  0xb0   :  { %3205 = vmatpush3.bf16.msra.mxu0 %v3204_v63  ;;  %v2097_v50 = vld [vmem:[%s4973_s1 + $0x620] sm:$0xff]  ;;  %v775_v55 = vld [vmem:[%s4972_s0 + $0x4a] sm:$0xff]  ;;  %v1598_v59 = vadd.f32 %v1597_v46, %v1545_v49  ;;  %v2100_v63 = vld [vmem:[%s4973_s1 + $0x638] sm:$0xff]  ;;  %v497_v0 = vadd.f32 %v496_v52, %v495_v38 }
  0xb1   :  { %3206 = vmatprep.subr.bf16.mxu0 %v3336_v3  ;;  %2569 = vmatmul.mubr.f32.vlgmr.msra.gmra.mrb[0].mxu1 %v479_v5  ;;  %v1989_v56 = vld [vmem:[%s4973_s1 + $0x2c0] sm:$0xff]  ;;  %v1990_v57 = vld [vmem:[%s4973_s1 + $0x2c8] sm:$0xff]  ;;  %v3216_v60 = vpack.c.bf16 %v2098_v51, %v2097_v50  ;;  %v822_v1 = vadd.f32 %v821_v53, %v775_v55  ;;  %v776_v4 = vld [vmem:[%s4972_s0 + $0x52] sm:$0xff]  ;;  %v1586_v7 = vrot.slane %v1585_v58, 4  ;;  %v3219_v9 = vpack.c.bf16 %v2100_v63, %v2099_v62 }
  0xb2   :  { %3043 = vmatpush3.bf16.msra.mxu1 %v3042_v8  ;;  %2603 = vmatprep.mubr.msk.f32.mxu1 %vm3337_vm0, %v3338_v11  ;;  %v1546_v61 = vld [vmem:[%s4972_s0 + $0xc4] sm:$0xff]  ;;  %v3054_v2 = vpack.c.bf16 %v1990_v57, %v1989_v56  ;;  %v1991_v5 = vld [vmem:[%s4973_s1 + $0x2d0] sm:$0xff]  ;;  %v1992_v6 = vld [vmem:[%s4973_s1 + $0x2d8] sm:$0xff]  ;;  %v498_v16 = vrot.slane %v497_v0, 2 }
  0xb3   :  { %3044 = vmatprep.subr.bf16.mxu1 %v3336_v3  ;;  %v1599_v8 = vadd.f32 %v1598_v59, %v1546_v61  ;;  %v1547_v10 = vld [vmem:[%s4972_s0 + $0xcc] sm:$0xff]  ;;  %v1554_v12 = vld [vmem:[%s4972_s0 + $0x104] sm:$0xff]  ;;  %v823_v17 = vadd.f32 %v822_v1, %v776_v4  ;;  %v777_v19 = vld [vmem:[%s4972_s0 + $0x5a] sm:$0xff]  ;;  %v1587_v22 = vadd.f32 %v1586_v7, %v1585_v58 }
  0xb4   :  { %3208 = vmatpush3.bf16.msra.mxu0 %v3207_v18  ;;  %v1555_v13 = vld [vmem:[%s4972_s0 + $0x10c] sm:$0xff]  ;;  %v2101_v14 = vld [vmem:[%s4973_s1 + $0x640] sm:$0xff]  ;;  %v3057_v18 = vpack.c.bf16 %v1992_v6, %v1991_v5  ;;  %v1548_v26 = vld [vmem:[%s4972_s0 + $0xd4] sm:$0xff]  ;;  %v499_v30 = vadd.f32 %v498_v16, %v497_v0 }
  0xb5   :  { %3209 = vmatprep.subr.bf16.mxu0 %v3336_v3  ;;  %v2102_v15 = vld [vmem:[%s4973_s1 + $0x648] sm:$0xff]  ;;  %v1993_v20 = vld [vmem:[%s4973_s1 + $0x2e0] sm:$0xff]  ;;  %v1600_v23 = vadd.f32 %v1599_v8, %v1547_v10  ;;  %v1614_v24 = vadd.f32 %v1555_v13, %v1554_v12  ;;  %v1556_v27 = vld [vmem:[%s4972_s0 + $0x114] sm:$0xff]  ;;  %v824_v31 = vadd.f32 %v823_v17, %v777_v19  ;;  %v1588_v36 = vrot.slane %v1587_v22, 2 }
  0xb6   :  { %3046 = vmatpush3.bf16.msra.mxu1 %v3045_v25  ;;  %v1994_v21 = vld [vmem:[%s4973_s1 + $0x2e8] sm:$0xff]  ;;  %v3222_v25 = vpack.c.bf16 %v2102_v15, %v2101_v14  ;;  %v2104_v29 = vld [vmem:[%s4973_s1 + $0x658] sm:$0xff]  ;;  %v1995_v34 = vld [vmem:[%s4973_s1 + $0x2f0] sm:$0xff]  ;;  %v500_v44 = vrot.slane %v499_v30, 1 }
  0xb7   :  { %2814 = vmatmul.mubr.f32.vlgmr.msra.gmra.mrb[0].mxu0 %v1257_v28  ;;  %3047 = vmatprep.subr.bf16.mxu1 %v3336_v3  ;;  %v2103_v28 = vld [vmem:[%s4973_s1 + $0x650] sm:$0xff]  ;;  %v3060_v32 = vpack.c.bf16 %v1994_v21, %v1993_v20  ;;  %v1996_v35 = vld [vmem:[%s4973_s1 + $0x2f8] sm:$0xff]  ;;  %v1601_v37 = vadd.f32 %v1600_v23, %v1548_v26  ;;  %v1615_v38 = vadd.f32 %v1614_v24, %v1556_v27  ;;  %v2105_v42 = vld [vmem:[%s4973_s1 + $0x660] sm:$0xff] }
  0xb8   :  { %3211 = vmatpush3.bf16.msra.mxu0 %v3210_v33  ;;  %2848 = vmatprep.mubr.msk.f32.mxu0 %vm3337_vm0, %v3338_v11  ;;  %v778_v33 = vld [vmem:[%s4972_s0 + $0x62] sm:$0xff]  ;;  %v3225_v39 = vpack.c.bf16 %v2104_v29, %v2103_v28  ;;  %v3063_v46 = vpack.c.bf16 %v1996_v35, %v1995_v34  ;;  %v1589_v50 = vadd.f32 %v1588_v36, %v1587_v22  ;;  %v2107_v56 = vld [vmem:[%s4973_s1 + $0x670] sm:$0xff]  ;;  %v2108_v57 = vld [vmem:[%s4973_s1 + $0x678] sm:$0xff] }
  0xb9   :  { %3212 = vmatprep.subr.bf16.mxu0 %v3336_v3  ;;  %v1549_v40 = vld [vmem:[%s4972_s0 + $0xdc] sm:$0xff]  ;;  %v2106_v43 = vld [vmem:[%s4973_s1 + $0x668] sm:$0xff]  ;;  %v825_v45 = vadd.f32 %v824_v31, %v778_v33  ;;  %v501_v58 = vadd.f32 %v500_v44, %v499_v30  ;;  %v780_v61 = vld [vmem:[%s4972_s0 + $0x72] sm:$0xff]  ;;  %v3231_v5 = vpack.c.bf16 %v2108_v57, %v2107_v56 }
  0xba   :  { %3049 = vmatpush3.bf16.msra.mxu1 %v3048_v41  ;;  %v1557_v41 = vld [vmem:[%s4972_s0 + $0x11c] sm:$0xff]  ;;  %v1998_v49 = vld [vmem:[%s4973_s1 + $0x308] sm:$0xff]  ;;  %v1602_v51 = vadd.f32 %v1601_v37, %v1549_v40  ;;  %v3228_v53 = vpack.c.bf16 %v2106_v43, %v2105_v42  ;;  %v1590_v62 = vrot.slane %v1589_v50, 1  ;;  %v1999_v63 = vld [vmem:[%s4973_s1 + $0x310] sm:$0xff] }
  0xbb   :  { %3050 = vmatprep.subr.bf16.mxu1 %v3336_v3  ;;  %v1997_v48 = vld [vmem:[%s4973_s1 + $0x300] sm:$0xff]  ;;  %v1616_v52 = vadd.f32 %v1615_v38, %v1557_v41  ;;  %v2000_v0 = vld [vmem:[%s4973_s1 + $0x318] sm:$0xff]  ;;  %v1551_v6 = vld [vmem:[%s4972_s0 + $0xec] sm:$0xff] }
  0xbc   :  { %3214 = vmatpush3.bf16.msra.mxu0 %v3213_v47  ;;  %v779_v47 = vld [vmem:[%s4972_s0 + $0x6a] sm:$0xff]  ;;  %v781_v1 = vld [vmem:[%s4972_s0 + $0x7a] sm:$0xf]  ;;  %v2109_v8 = vld [vmem:[%s4973_s1 + $0x680] sm:$0xff]  ;;  %v3069_v12 = vpack.c.bf16 %v2000_v0, %v1999_v63  ;;  %v1591_v14 = vadd.f32 %v1590_v62, %v1589_v50 }
  0xbd   :  { %3215 = vmatprep.subr.bf16.mxu0 %v3336_v3  ;;  %v1558_v55 = vld [vmem:[%s4972_s0 + $0x124] sm:$0xff]  ;;  %v826_v59 = vadd.f32 %v825_v45, %v779_v47  ;;  %v1559_v7 = vld [vmem:[%s4972_s0 + $0x12c] sm:$0xff]  ;;  %v828_v13 = vsel %vm74_vm1, %v781_v1, 0.0  ;;  %v1552_v20 = vld [vmem:[%s4972_s0 + $0xf4] sm:$0xff] }
  0xbe   :  { %3052 = vmatpush3.bf16.msra.mxu1 %v3051_v54  ;;  %v1550_v54 = vld [vmem:[%s4972_s0 + $0xe4] sm:$0xff]  ;;  %v1617_v4 = vadd.f32 %v1616_v52, %v1558_v55  ;;  %v1560_v21 = vld [vmem:[%s4972_s0 + $0x134] sm:$0xff]  ;;  %v1561_v33 = vld [vmem:[%s4972_s0 + $0x13c] sm:$0xff] }
  0xbf   :  { %3053 = vmatprep.subr.bf16.mxu1 %v3336_v3  ;;  %v827_v10 = vadd.f32 %v826_v59, %v780_v61  ;;  %v2001_v15 = vld [vmem:[%s4973_s1 + $0x320] sm:$0xff]  ;;  %v2002_v16 = vld [vmem:[%s4973_s1 + $0x328] sm:$0xff]  ;;  %v2111_v22 = vld [vmem:[%s4973_s1 + $0x690] sm:$0xff] }
  0xc0   :  { %3217 = vmatpush3.bf16.msra.mxu0 %v3216_v60  ;;  %v3066_v60 = vpack.c.bf16 %v1998_v49, %v1997_v48  ;;  %v2112_v23 = vld [vmem:[%s4973_s1 + $0x698] sm:$0xff]  ;;  %v3072_v26 = vpack.c.bf16 %v2002_v16, %v2001_v15  ;;  %v2003_v27 = vld [vmem:[%s4973_s1 + $0x330] sm:$0xff]  ;;  %v2113_v34 = vld [vmem:[%s4973_s1 + $0x6a0] sm:$0xff] }
  0xc1   :  { %3218 = vmatprep.subr.bf16.mxu0 %v3336_v3  ;;  %v829_v24 = vadd.f32 %v828_v13, %v827_v10  ;;  %v2004_v28 = vld [vmem:[%s4973_s1 + $0x338] sm:$0xff]  ;;  %v3237_v31 = vpack.c.bf16 %v2112_v23, %v2111_v22  ;;  %v2114_v35 = vld [vmem:[%s4973_s1 + $0x6a8] sm:$0xff]  ;;  %v2005_v38 = vld [vmem:[%s4973_s1 + $0x340] sm:$0xff] }
  0xc2   :  { %3055 = vmatpush3.bf16.msra.mxu1 %v3054_v2  ;;  %v1603_v2 = vadd.f32 %v1602_v51, %v1550_v54  ;;  %v3075_v37 = vpack.c.bf16 %v2004_v28, %v2003_v27  ;;  %v3240_v42 = vpack.c.bf16 %v2114_v35, %v2113_v34  ;;  %v1562_v43 = vld [vmem:[%s4972_s0 + $0x144] sm:$0xff]  ;;  %v2115_v44 = vld [vmem:[%s4973_s1 + $0x6b0] sm:$0xff]  ;;  %v2116_v45 = vld [vmem:[%s4973_s1 + $0x6b8] sm:$0xff] }
  0xc3   :  { %3056 = vmatprep.subr.bf16.mxu1 %v3336_v3  ;;  %v830_v36 = vrot.slane %v829_v24, 4  ;;  %v2007_v48 = vld [vmem:[%s4973_s1 + $0x350] sm:$0xff]  ;;  %v2008_v49 = vld [vmem:[%s4973_s1 + $0x358] sm:$0xff]  ;;  %v3243_v52 = vpack.c.bf16 %v2116_v45, %v2115_v44  ;;  %v2117_v54 = vld [vmem:[%s4973_s1 + $0x6c0] sm:$0xff] }
  0xc4   :  { %3220 = vmatpush3.bf16.msra.mxu0 %v3219_v9  ;;  %v2110_v9 = vld [vmem:[%s4973_s1 + $0x688] sm:$0xff]  ;;  %v1604_v17 = vadd.f32 %v1603_v2, %v1551_v6  ;;  %v3081_v57 = vpack.c.bf16 %v2008_v49, %v2007_v48  ;;  %v1564_v63 = vld [vmem:[%s4972_s0 + $0x154] sm:$0xff]  ;;  %v1565_v10 = vld [vmem:[%s4972_s0 + $0x15c] sm:$0xff] }
  0xc5   :  { %3221 = vmatprep.subr.bf16.mxu0 %v3336_v3  ;;  %v3234_v19 = vpack.c.bf16 %v2110_v9, %v2109_v8  ;;  %v2118_v55 = vld [vmem:[%s4973_s1 + $0x6c8] sm:$0xff]  ;;  %v2119_v0 = vld [vmem:[%s4973_s1 + $0x6d0] sm:$0xff]  ;;  %v2120_v1 = vld [vmem:[%s4973_s1 + $0x6d8] sm:$0xff] }
  0xc6   :  { %3058 = vmatpush3.bf16.msra.mxu1 %v3057_v18  ;;  %v1618_v18 = vadd.f32 %v1617_v4, %v1559_v7  ;;  %v1605_v29 = vadd.f32 %v1604_v17, %v1552_v20  ;;  %v2010_v59 = vld [vmem:[%s4973_s1 + $0x368] sm:$0xff]  ;;  %v3246_v62 = vpack.c.bf16 %v2118_v55, %v2117_v54  ;;  %v2012_v6 = vld [vmem:[%s4973_s1 + $0x378] sm:$0xff]  ;;  %v3249_v9 = vpack.c.bf16 %v2120_v1, %v2119_v0  ;;  %v2123_v20 = vld [vmem:[%s4973_s1 + $0x6f0] sm:$0xff] }
  0xc7   :  { %3059 = vmatprep.subr.bf16.mxu1 %v3336_v3  ;;  %v2122_v13 = vld [vmem:[%s4973_s1 + $0x6e8] sm:$0xff]  ;;  %v2125_v27 = vld [vmem:[%s4973_s1 + $0x700] sm:$0xff]  ;;  %v2128_v34 = vld [vmem:[%s4973_s1 + $0x718] sm:$0xff] }
  0xc8   :  { %3223 = vmatpush3.bf16.msra.mxu0 %v3222_v25  ;;  %v1553_v25 = vld [vmem:[%s4972_s0 + $0xfc] sm:$0xf]  ;;  %v1619_v30 = vadd.f32 %v1618_v18, %v1560_v21  ;;  %v2126_v28 = vld [vmem:[%s4973_s1 + $0x708] sm:$0xff]  ;;  %v2137_v54 = vld [vmem:[%s4973_s1 + $0x760] sm:$0xff] }
  0xc9   :  { %3224 = vmatprep.subr.bf16.mxu0 %v3336_v3  ;;  %v2124_v21 = vld [vmem:[%s4973_s1 + $0x6f8] sm:$0xff]  ;;  %v2138_v55 = vld [vmem:[%s4973_s1 + $0x768] sm:$0xff] }
  0xca   :  { %3061 = vmatpush3.bf16.msra.mxu1 %v3060_v32  ;;  %v1606_v32 = vsel %vm74_vm1, %v1553_v25, 0.0  ;;  %v1620_v41 = vadd.f32 %v1619_v30, %v1561_v33  ;;  %v3255_v25 = vpack.c.bf16 %v2124_v21, %v2123_v20  ;;  %v2127_v33 = vld [vmem:[%s4973_s1 + $0x710] sm:$0xff]  ;;  %v1569_v35 = vld [vmem:[%s4972_s0 + $0x17c] sm:$0xf] }
  0xcb   :  { %3062 = vmatprep.subr.bf16.mxu1 %v3336_v3  ;;  %v1607_v40 = vadd.f32 %v1606_v32, %v1605_v29  ;;  %v1568_v32 = vld [vmem:[%s4972_s0 + $0x174] sm:$0xff] }
  0xcc   :  { %3226 = vmatpush3.bf16.msra.mxu0 %v3225_v39  ;;  %v2006_v39 = vld [vmem:[%s4973_s1 + $0x348] sm:$0xff]  ;;  %v1621_v51 = vadd.f32 %v1620_v41, %v1562_v43  ;;  %v2132_v43 = vld [vmem:[%s4973_s1 + $0x738] sm:$0xff] }
  0xcd   :  { %3227 = vmatprep.subr.bf16.mxu0 %v3336_v3  ;;  %v3078_v47 = vpack.c.bf16 %v2006_v39, %v2005_v38  ;;  %v1608_v50 = vrot.slane %v1607_v40, 4  ;;  %v1628_v38 = vsel %vm74_vm1, %v1569_v35, 0.0  ;;  %v2129_v39 = vld [vmem:[%s4973_s1 + $0x720] sm:$0xff] }
  0xce   :  { %3064 = vmatpush3.bf16.msra.mxu1 %v3063_v46  ;;  %v831_v46 = vadd.f32 %v830_v36, %v829_v24 }
  0xcf   :  { %3065 = vmatprep.subr.bf16.mxu1 %v3336_v3 }
  0xd0   :  { %3229 = vmatpush3.bf16.msra.mxu0 %v3228_v53  ;;  %v1563_v53 = vld [vmem:[%s4972_s0 + $0x14c] sm:$0xff]  ;;  %v832_v56 = vrot.slane %v831_v46, 2 }
  0xd1   :  { %3230 = vmatprep.subr.bf16.mxu0 %v3336_v3  ;;  %2604 = vmatmul.mubr.f32.vlgmr.msra.gmra.mrb[0].mxu1 %v501_v58  ;;  %v2009_v58 = vld [vmem:[%s4973_s1 + $0x360] sm:$0xff]  ;;  %v1622_v61 = vadd.f32 %v1621_v51, %v1563_v53  ;;  %v2136_v51 = vld [vmem:[%s4973_s1 + $0x758] sm:$0xff] }
  0xd2   :  { %3067 = vmatpush3.bf16.msra.mxu1 %v3066_v60  ;;  %2638 = vmatprep.mubr.msk.f32.mxu1 %vm3337_vm0, %v3338_v11  ;;  %v1609_v60 = vadd.f32 %v1608_v50, %v1607_v40  ;;  %v833_v2 = vadd.f32 %v832_v56, %v831_v46  ;;  %v3084_v4 = vpack.c.bf16 %v2010_v59, %v2009_v58  ;;  %v2130_v40 = vld [vmem:[%s4973_s1 + $0x728] sm:$0xff]  ;;  %v2133_v46 = vld [vmem:[%s4973_s1 + $0x740] sm:$0xff]  ;;  %v2135_v50 = vld [vmem:[%s4973_s1 + $0x750] sm:$0xff] }
  0xd3   :  { %3068 = vmatprep.subr.bf16.mxu1 %v3336_v3  ;;  %v1623_v8 = vadd.f32 %v1622_v61, %v1564_v63  ;;  %v3273_v53 = vpack.c.bf16 %v2136_v51, %v2135_v50  ;;  %v2139_v58 = vld [vmem:[%s4973_s1 + $0x770] sm:$0xff]  ;;  %v2140_v59 = vld [vmem:[%s4973_s1 + $0x778] sm:$0xff] }
  0xd4   :  { %3232 = vmatpush3.bf16.msra.mxu0 %v3231_v5  ;;  %v2011_v5 = vld [vmem:[%s4973_s1 + $0x370] sm:$0xff]  ;;  %v1610_v7 = vrot.slane %v1609_v60, 2  ;;  %v3279_v61 = vpack.c.bf16 %v2140_v59, %v2139_v58 }
  0xd5   :  { %3233 = vmatprep.subr.bf16.mxu0 %v3336_v3  ;;  %v3087_v15 = vpack.c.bf16 %v2012_v6, %v2011_v5  ;;  %v1624_v17 = vadd.f32 %v1623_v8, %v1565_v10 }
  0xd6   :  { %3070 = vmatpush3.bf16.msra.mxu1 %v3069_v12  ;;  %v2121_v12 = vld [vmem:[%s4973_s1 + $0x6e0] sm:$0xff]  ;;  %v1611_v16 = vadd.f32 %v1610_v7, %v1609_v60 }
  0xd7   :  { %2849 = vmatmul.mubr.f32.vlgmr.msra.gmra.mrb[0].mxu0 %v1591_v14  ;;  %3071 = vmatprep.subr.bf16.mxu1 %v3336_v3  ;;  %v834_v14 = vrot.slane %v833_v2, 1  ;;  %v3252_v18 = vpack.c.bf16 %v2122_v13, %v2121_v12 }
  0xd8   :  { %3235 = vmatpush3.bf16.msra.mxu0 %v3234_v19  ;;  %2883 = vmatprep.mubr.msk.f32.mxu0 %vm3337_vm0, %v3338_v11  ;;  %v1566_v19 = vld [vmem:[%s4972_s0 + $0x164] sm:$0xff]  ;;  %v1612_v23 = vrot.slane %v1611_v16, 1 }
  0xd9   :  { %3236 = vmatprep.subr.bf16.mxu0 %v3336_v3  ;;  %v835_v22 = vadd.f32 %v834_v14, %v833_v2  ;;  %v1625_v24 = vadd.f32 %v1624_v17, %v1566_v19 }
  0xda   :  { %3073 = vmatpush3.bf16.msra.mxu1 %v3072_v26  ;;  %v1567_v26 = vld [vmem:[%s4972_s0 + $0x16c] sm:$0xff]  ;;  %v1613_v29 = vadd.f32 %v1612_v23, %v1611_v16 }
  0xdb   :  { %3074 = vmatprep.subr.bf16.mxu1 %v3336_v3  ;;  %v1626_v30 = vadd.f32 %v1625_v24, %v1567_v26 }
  0xdc   :  { %3238 = vmatpush3.bf16.msra.mxu0 %v3237_v31  ;;  %v3258_v31 = vpack.c.bf16 %v2126_v28, %v2125_v27 }
  0xdd   :  { %3239 = vmatprep.subr.bf16.mxu0 %v3336_v3  ;;  %v1627_v36 = vadd.f32 %v1626_v30, %v1568_v32 }
  0xde   :  { %3076 = vmatpush3.bf16.msra.mxu1 %v3075_v37  ;;  %v3261_v37 = vpack.c.bf16 %v2128_v34, %v2127_v33 }
  0xdf   :  { %3077 = vmatprep.subr.bf16.mxu1 %v3336_v3  ;;  %v1629_v41 = vadd.f32 %v1628_v38, %v1627_v36 }
  0xe0   :  { %3241 = vmatpush3.bf16.msra.mxu0 %v3240_v42  ;;  %v3264_v42 = vpack.c.bf16 %v2130_v40, %v2129_v39 }
  0xe1   :  { %3242 = vmatprep.subr.bf16.mxu0 %v3336_v3  ;;  %v1630_v44 = vrot.slane %v1629_v41, 4 }
  0xe2   :  { %3079 = vmatpush3.bf16.msra.mxu1 %v3078_v47  ;;  %v2134_v47 = vld [vmem:[%s4973_s1 + $0x748] sm:$0xff] }
  0xe3   :  { %3080 = vmatprep.subr.bf16.mxu1 %v3336_v3  ;;  %v1631_v48 = vadd.f32 %v1630_v44, %v1629_v41  ;;  %v3270_v49 = vpack.c.bf16 %v2134_v47, %v2133_v46 }
  0xe4   :  { %3244 = vmatpush3.bf16.msra.mxu0 %v3243_v52 }
  0xe5   :  { %3245 = vmatprep.subr.bf16.mxu0 %v3336_v3  ;;  %v1632_v52 = vrot.slane %v1631_v48, 2 }
  0xe6   :  { %3082 = vmatpush3.bf16.msra.mxu1 %v3081_v57  ;;  %v3276_v57 = vpack.c.bf16 %v2138_v55, %v2137_v54 }
  0xe7   :  { %3083 = vmatprep.subr.bf16.mxu1 %v3336_v3  ;;  %v1633_v56 = vadd.f32 %v1632_v52, %v1631_v48 }
  0xe8   :  { %3247 = vmatpush3.bf16.msra.mxu0 %v3246_v62 }
  0xe9   :  { %3248 = vmatprep.subr.bf16.mxu0 %v3336_v3  ;;  %v1634_v60 = vrot.slane %v1633_v56, 1 }
  0xea   :  { %3085 = vmatpush3.bf16.msra.mxu1 %v3084_v4 }
  0xeb   :  { %3086 = vmatprep.subr.bf16.mxu1 %v3336_v3  ;;  %v1635_v62 = vadd.f32 %v1634_v60, %v1633_v56 }
  0xec   :  { %3250 = vmatpush3.bf16.msra.mxu0 %v3249_v9 }
  0xed   :  { %3251 = vmatprep.subr.bf16.mxu0 %v3336_v3 }
  0xee   :  { %3088 = vmatpush3.bf16.msra.mxu1 %v3087_v15 }
  0xf0   :  { %3253 = vmatpush3.bf16.msra.mxu0 %v3252_v18 }
  0xf1   :  { %3254 = vmatprep.subr.bf16.mxu0 %v3336_v3  ;;  %2639 = vmatmul.mubr.f32.vlgmr.msra.gmra.mrb[0].mxu1 %v835_v22 }
  0xf4   :  { %3256 = vmatpush3.bf16.msra.mxu0 %v3255_v25 }
  0xf5   :  { %3257 = vmatprep.subr.bf16.mxu0 %v3336_v3 }
  0xf7   :  { %2884 = vmatmul.mubr.f32.vlgmr.msra.gmra.mrb[0].mxu0 %v1613_v29 }
  0xf8   :  { %3259 = vmatpush3.bf16.msra.mxu0 %v3258_v31  ;;  %2918 = vmatprep.mubr.msk.f32.mxu0 %vm3337_vm0, %v3338_v11  ;;  %v2131_v11 = vld [vmem:[%s4973_s1 + $0x730] sm:$0xff]  ;;  %s3312_s1 = scalar_lea.vmem %s1910_s17, 16 }
  0xf9   :  { %3260 = vmatprep.subr.bf16.mxu0 %v3336_v3  ;;  %v3267_v45 = vpack.c.bf16 %v2132_v43, %v2131_v11  ;;  %p3313_p0 = scmp.ne.s32.totalorder %s1910_s17, %s3312_s1  ;;  %p3318_p2 = scmp.lt.s32.totalorder %s3316_s18, %s3312_s1 }
  0xfb   :  { %p3319_p3 = por %p3318_p2, %p3317_p1 }
  0xfc   :  { %3262 = vmatpush3.bf16.msra.mxu0 %v3261_v37 }
  0xfd   :  { %3263 = vmatprep.subr.bf16.mxu0 %v3336_v3  ;;  %p3320_p4 = pnand %p3319_p3, %p3313_p0 }
 0x100   :  { %3265 = vmatpush3.bf16.msra.mxu0 %v3264_v42 }
 0x101   :  { %3266 = vmatprep.subr.bf16.mxu0 %v3336_v3 }
 0x104   :  { %3268 = vmatpush3.bf16.msra.mxu0 %v3267_v45 }
 0x105   :  { %3269 = vmatprep.subr.bf16.mxu0 %v3336_v3 }
 0x108   :  { %3271 = vmatpush3.bf16.msra.mxu0 %v3270_v49 }
 0x109   :  { %3272 = vmatprep.subr.bf16.mxu0 %v3336_v3 }
 0x10c   :  { %3274 = vmatpush3.bf16.msra.mxu0 %v3273_v53 }
 0x10d   :  { %3275 = vmatprep.subr.bf16.mxu0 %v3336_v3 }
 0x110   :  { %3277 = vmatpush3.bf16.msra.mxu0 %v3276_v57 }
 0x111   :  { %3278 = vmatprep.subr.bf16.mxu0 %v3336_v3 }
 0x114   :  { %3280 = vmatpush3.bf16.msra.mxu0 %v3279_v61 }
 0x117   :  { %2919 = vmatmul.mubr.f32.vlgmr.msra.gmra.mrb[0].mxu0 %v1635_v62 }
 0x1c4   :  { %v963_v63 = vpop.f32.mrb[0].mxu1 }
 0x1c5   :  { %v2640_v0 = vpop.f32.mrb[1].mxu1 }
 0x1ea   :  { %v1895_v1 = vpop.f32.mrb[0].mxu0 }
 0x1eb   :  { %v3281_v2 = vadd.f32 %v1895_v1, %v963_v63  ;;  %v2920_v4 = vpop.f32.mrb[1].mxu0 }
 0x1ed   :  { %v1900_v5 = vmul.f32 6.503642e-05, %v3281_v2 }
 0x1ef   :  { %1902 = vst.msk [vmem:[#allocation2] sm:$0x1] %vm1901_vm2, %v1900_v5 }
 0x1f0   :  { %3323 = shalt.err (!%p3320_p4)
}
 0x1f1   :  { %s3324_s21 = scalar_lea.hbm %s4974_s2, 16 }
 0x1f2   :  { %p3325_p5 = scmp.ne.s32.totalorder %s4974_s2, %s3324_s21  ;;  %p3328_p6 = scmp.lt.u32.totalorder %s3324_s21, %s4974_s2 }
 0x1f4   :  { %p3330_p7 = pnand %p3328_p6, %p3325_p5 }
 0x1f6   :  { %3333 = shalt.err (!%p3330_p7)
}
 0x1f7   :  { %1912 = dma.vmem_to_hbm [thread:$0]  %s1910_s17, 16, %s4974_s2, [#allocation3]  }
 0x1f8   :  { %3334 = dma.done.wait [#allocation3], 16  }
 0x1f9   :  { %3335 = vsyncadd [#allocation3], 4294967280 }
 0x1fa   :  { %1916 = vsyncpa [#allocation3], 1 }

</bundles_post_ra>
